<compile_context>
chip_gen: v7x
topology: tpu7x:2x2x1
jax: 0.10.0
libtpu: 0.0.40
codegen_flags: <defaults>
</compile_context>

<pallas_src>
import math

import jax
import jax.numpy as jnp
from jax.experimental import pallas as pl
from jax.experimental.pallas import tpu as pltpu


def _round_up(x, m):
    return (x + m - 1) // m * m


def _nbytes(shape, dtype):
    return math.prod(shape) * jnp.dtype(dtype).itemsize


def _vmem_limit(nbytes):
    # generous headroom over the estimated working set; always >= the per-gen
    # scoped default and never above v7x's 64 MiB physical VMEM.
    return int(min(max(2 * nbytes + (4 << 20), 32 << 20), 64 << 20))


# -----------------------------------------------------------------------------
# Kernel A (fused): map_feat + GRU recurrence + classifier in one grid step.
# Logits of step t are stored at columns [t*V, (t+1)*V) of a (B, T*V) slab.
# -----------------------------------------------------------------------------
def _fused_caption_kernel(
    x_ref,       # (T*B, E)  bf16  word embeddings, time-major, flattened
    obj_ref,     # (B, F)    bf16  object features
    wmap_ref,    # (F, E)    bf16  map_feat weight
    bmap_ref,    # (1, E)    f32   map_feat bias
    wi_ref,      # (E, 3E)   bf16  fused input-gate weights  [W_ir | W_iz | W_in]
    bi_ref,      # (1, 3E)   f32   folded biases [b_ir+b_hr | b_iz+b_hz | b_in]
    wh_ref,      # (E, 3E)   bf16  fused hidden-gate weights [W_hr | W_hz | W_hn]
    bhn_ref,     # (1, E)    f32   b_hn (stays inside the r * (.) term)
    wcls_ref,    # (E, V)    bf16  classifier weight (V padded to lane multiple)
    bcls_ref,    # (1, V)    f32   classifier bias
    out_ref,     # (B, T*V)  f32   logits, interleaved by step
    xw_ref,      # VMEM scratch (T*B, 3E) f32: precomputed x-side gates
):
    B = obj_ref.shape[0]
    E = bhn_ref.shape[1]
    V = bcls_ref.shape[1]
    T = x_ref.shape[0] // B

    # hidden_0 = ReLU(obj_feats @ W_map + b_map)
    h0 = jnp.dot(obj_ref[...], wmap_ref[...],
                 preferred_element_type=jnp.float32) + bmap_ref[...]
    h0 = jnp.maximum(h0, 0.0)

    # Hoisted x-side gate GEMM for all timesteps at once (M = T*B, not B).
    xw_ref[...] = (
        jnp.dot(x_ref[...], wi_ref[...], preferred_element_type=jnp.float32)
        + bi_ref[...]
    )

    def step(t, h):
        row = pl.multiple_of(t * B, B)
        gx = xw_ref[pl.ds(row, B), :]                        # (B, 3E), biases folded
        gh = jnp.dot(h.astype(jnp.bfloat16), wh_ref[...],
                     preferred_element_type=jnp.float32)     # (B, 3E)
        r = jax.nn.sigmoid(gx[:, :E] + gh[:, :E])
        z = jax.nn.sigmoid(gx[:, E:2 * E] + gh[:, E:2 * E])
        n = jnp.tanh(gx[:, 2 * E:] + r * (gh[:, 2 * E:] + bhn_ref[...]))
        h_new = (1.0 - z) * n + z * h
        # classifier fused into the recurrence: independent of the next step's
        # h @ W_h, so the scheduler can overlap it with the next recurrent matmul.
        logits = (jnp.dot(h_new.astype(jnp.bfloat16), wcls_ref[...],
                          preferred_element_type=jnp.float32) + bcls_ref[...])
        col = pl.multiple_of(t * V, 128)                     # V % 128 == 0 (padded)
        out_ref[:, pl.ds(col, V)] = logits
        return h_new

    jax.lax.fori_loop(0, T, step, h0, unroll=min(T, 8))


# -----------------------------------------------------------------------------
# Kernel B (split path): GRU recurrence only, hidden states emitted in bf16.
# -----------------------------------------------------------------------------
def _gru_kernel(
    x_ref,       # (T*B, E)  bf16
    obj_ref,     # (B, F)    bf16
    wmap_ref,    # (F, E)    bf16
    bmap_ref,    # (1, E)    f32
    wi_ref,      # (E, 3E)   bf16
    bi_ref,      # (1, 3E)   f32
    wh_ref,      # (E, 3E)   bf16
    bhn_ref,     # (1, E)    f32
    h_out_ref,   # (T*B, E)  bf16  hidden state of every step (time-major)
    xw_ref,      # VMEM scratch (T*B, 3E) f32
):
    B = obj_ref.shape[0]
    E = bhn_ref.shape[1]
    T = x_ref.shape[0] // B

    h0 = jnp.dot(obj_ref[...], wmap_ref[...],
                 preferred_element_type=jnp.float32) + bmap_ref[...]
    h0 = jnp.maximum(h0, 0.0)

    xw_ref[...] = (
        jnp.dot(x_ref[...], wi_ref[...], preferred_element_type=jnp.float32)
        + bi_ref[...]
    )

    def step(t, h):
        row = pl.multiple_of(t * B, B)
        gx = xw_ref[pl.ds(row, B), :]
        gh = jnp.dot(h.astype(jnp.bfloat16), wh_ref[...],
                     preferred_element_type=jnp.float32)
        r = jax.nn.sigmoid(gx[:, :E] + gh[:, :E])
        z = jax.nn.sigmoid(gx[:, E:2 * E] + gh[:, E:2 * E])
        n = jnp.tanh(gx[:, 2 * E:] + r * (gh[:, 2 * E:] + bhn_ref[...]))
        h_new = (1.0 - z) * n + z * h                         # carry stays f32
        h_out_ref[pl.ds(row, B), :] = h_new.astype(jnp.bfloat16)
        return h_new

    jax.lax.fori_loop(0, T, step, h0, unroll=min(T, 8))


# -----------------------------------------------------------------------------
# Kernel C (split path): classifier, gridded over (time step, vocab tile),
# writing directly into the interleaved (B, T*V) logits layout.
# -----------------------------------------------------------------------------
def _classifier_kernel(h_ref, w_ref, b_ref, out_ref):
    out_ref[...] = (
        jnp.dot(h_ref[...], w_ref[...], preferred_element_type=jnp.float32)
        + b_ref[...]
    )


# -----------------------------------------------------------------------------
# Wrapper
# -----------------------------------------------------------------------------
def caption_forward(word_embs, obj_feats, params, num_words, *, force_split=False):
    """word_embs: (B, T, E) f32, obj_feats: (B, F) f32 -> lang_cap: (B, num_words-1, V)."""
    B0, T_full, E = word_embs.shape
    F_ = obj_feats.shape[1]
    V0 = params["w_cls"].shape[1]
    num_steps = int(num_words) - 1
    assert 1 <= num_steps <= T_full

    # Pad batch to a multiple of 16 (bf16 sublane packing); padded rows sliced off.
    B = _round_up(B0, 16)
    if B != B0:
        word_embs = jnp.pad(word_embs, ((0, B - B0), (0, 0), (0, 0)))
        obj_feats = jnp.pad(obj_feats, ((0, B - B0), (0, 0)))
    TB = num_steps * B

    # Pad vocab to a lane multiple so every classifier store is unmasked/lane-dense.
    V = _round_up(V0, 128)
    w_cls, b_cls = params["w_cls"], params["b_cls"]
    if V != V0:
        w_cls = jnp.pad(w_cls, ((0, 0), (0, V - V0)))
        b_cls = jnp.pad(b_cls, ((0, 0), (0, V - V0)))

    # Time-major, flattened, bf16 MXU operands.
    x2d = (jnp.transpose(word_embs[:, :num_steps, :], (1, 0, 2))
           .reshape(TB, E).astype(jnp.bfloat16))
    obj_bf16 = obj_feats.astype(jnp.bfloat16)

    gru_in_specs = [
        pl.BlockSpec((TB, E), lambda i: (0, 0)),       # x (time-major)
        pl.BlockSpec((B, F_), lambda i: (0, 0)),       # obj feats
        pl.BlockSpec((F_, E), lambda i: (0, 0)),       # w_map
        pl.BlockSpec((1, E), lambda i: (0, 0)),        # b_map
        pl.BlockSpec((E, 3 * E), lambda i: (0, 0)),    # w_i fused
        pl.BlockSpec((1, 3 * E), lambda i: (0, 0)),    # b_i folded
        pl.BlockSpec((E, 3 * E), lambda i: (0, 0)),    # w_h fused
        pl.BlockSpec((1, E), lambda i: (0, 0)),        # b_hn
    ]
    gru_args = (x2d, obj_bf16, params["w_map"], params["b_map"],
                params["w_i"], params["b_i"], params["w_h"], params["b_hn"])

    # Rough VMEM working-set estimate (x2 for default double-buffered blocks).
    gru_bytes = 2 * (
        _nbytes((TB, E), jnp.bfloat16) + _nbytes((B, F_), jnp.bfloat16)
        + _nbytes((F_, E), jnp.bfloat16) + _nbytes((1, E), jnp.float32)
        + 2 * _nbytes((E, 3 * E), jnp.bfloat16) + _nbytes((1, 3 * E), jnp.float32)
        + _nbytes((1, E), jnp.float32)
    ) + _nbytes((TB, 3 * E), jnp.float32)
    fused_extra = 2 * (
        _nbytes((E, V), jnp.bfloat16) + _nbytes((1, V), jnp.float32)
        + _nbytes((B, num_steps * V), jnp.float32)
    )

    # Fuse the classifier when W_cls + the logits slab comfortably fit VMEM
    # (leaves headroom under the v7x 64 MiB budget); else stream vocab tiles.
    fuse = (not force_split) and (gru_bytes + fused_extra <= (40 << 20))

    if fuse:
        logits2d = pl.pallas_call(
            _fused_caption_kernel,
            out_shape=jax.ShapeDtypeStruct((B, num_steps * V), jnp.float32),
            grid_spec=pltpu.PrefetchScalarGridSpec(
                num_scalar_prefetch=0,
                grid=(1,),
                in_specs=gru_in_specs + [
                    pl.BlockSpec((E, V), lambda i: (0, 0)),     # w_cls
                    pl.BlockSpec((1, V), lambda i: (0, 0)),     # b_cls
                ],
                out_specs=pl.BlockSpec((B, num_steps * V), lambda i: (0, 0)),
                scratch_shapes=[pltpu.VMEM((TB, 3 * E), jnp.float32)],
            ),
            compiler_params=pltpu.CompilerParams(
                dimension_semantics=("arbitrary",),
                vmem_limit_bytes=_vmem_limit(gru_bytes + fused_extra),
            ),
        )(*gru_args, w_cls, b_cls)
    else:
        # ---- recurrent kernel: all hidden states, emitted in bf16 -----------
        h_bytes = 2 * _nbytes((TB, E), jnp.bfloat16)
        h_states = pl.pallas_call(
            _gru_kernel,
            out_shape=jax.ShapeDtypeStruct((TB, E), jnp.bfloat16),
            grid_spec=pltpu.PrefetchScalarGridSpec(
                num_scalar_prefetch=0,
                grid=(1,),
                in_specs=gru_in_specs,
                out_specs=pl.BlockSpec((TB, E), lambda i: (0, 0)),
                scratch_shapes=[pltpu.VMEM((TB, 3 * E), jnp.float32)],
            ),
            compiler_params=pltpu.CompilerParams(
                dimension_semantics=("arbitrary",),
                vmem_limit_bytes=_vmem_limit(gru_bytes + h_bytes),
            ),
        )(*gru_args)

        # ---- classifier: grid over (time step, vocab tile) -------------------
        TV = 128
        for cand in (2048, 1024, 512, 256, 128):
            if V % cand == 0:
                TV = cand
                break
        nV = V // TV
        cls_bytes = 2 * (
            _nbytes((B, E), jnp.bfloat16) + _nbytes((E, TV), jnp.bfloat16)
            + _nbytes((1, TV), jnp.float32) + _nbytes((B, TV), jnp.float32)
        )
        logits2d = pl.pallas_call(
            _classifier_kernel,
            out_shape=jax.ShapeDtypeStruct((B, num_steps * V), jnp.float32),
            grid_spec=pltpu.PrefetchScalarGridSpec(
                num_scalar_prefetch=0,
                grid=(num_steps, nV),
                in_specs=[
                    pl.BlockSpec((B, E), lambda t, j: (t, 0)),    # h block of step t
                    pl.BlockSpec((E, TV), lambda t, j: (0, j)),   # w_cls tile
                    pl.BlockSpec((1, TV), lambda t, j: (0, j)),   # b_cls tile
                ],
                out_specs=pl.BlockSpec((B, TV), lambda t, j: (0, t * nV + j)),
            ),
            compiler_params=pltpu.CompilerParams(
                dimension_semantics=("parallel", "parallel"),
                vmem_limit_bytes=_vmem_limit(cls_bytes),
            ),
        )(h_states, w_cls, b_cls)

    # (B, T*V) -> (B, T, V) is a free view of the interleaved layout; then drop
    # the batch / vocab padding.
    out = logits2d.reshape(B, num_steps, V)
    return out[:B0, :, :V0]


# -----------------------------------------------------------------------------
# Parameter handling
# -----------------------------------------------------------------------------
def init_params(key, feat_size, emb_size, num_vocabs):
    keys = jax.random.split(key, 20)
    s = 0.1
    mat = lambda k, shape: (s * jax.random.normal(k, shape)).astype(jnp.float32)
    return {
        "w_map": mat(keys[0], (feat_size, emb_size)),
        "b_map": mat(keys[1], (1, emb_size)),
        "w_ir": mat(keys[2], (emb_size, emb_size)),
        "w_iz": mat(keys[3], (emb_size, emb_size)),
        "w_in": mat(keys[4], (emb_size, emb_size)),
        "w_hr": mat(keys[5], (emb_size, emb_size)),
        "w_hz": mat(keys[6], (emb_size, emb_size)),
        "w_hn": mat(keys[7], (emb_size, emb_size)),
        "b_ir": mat(keys[8], (1, emb_size)),
        "b_iz": mat(keys[9], (1, emb_size)),
        "b_in": mat(keys[10], (1, emb_size)),
        "b_hr": mat(keys[11], (1, emb_size)),
        "b_hz": mat(keys[12], (1, emb_size)),
        "b_hn": mat(keys[13], (1, emb_size)),
        "w_cls": mat(keys[14], (emb_size, num_vocabs)),
        "b_cls": mat(keys[15], (1, num_vocabs)),
    }


def pack_params(p):
    """Fuse gate weights, fold constant bias pairs, cast matmul weights to bf16."""
    bf16 = jnp.bfloat16
    return {
        "w_map": p["w_map"].astype(bf16),
        "b_map": p["b_map"],
        "w_i": jnp.concatenate([p["w_ir"], p["w_iz"], p["w_in"]], axis=1).astype(bf16),
        "b_i": jnp.concatenate(
            [p["b_ir"] + p["b_hr"], p["b_iz"] + p["b_hz"], p["b_in"]], axis=1),
        "w_h": jnp.concatenate([p["w_hr"], p["w_hz"], p["w_hn"]], axis=1).astype(bf16),
        "b_hn": p["b_hn"],
        "w_cls": p["w_cls"].astype(bf16),
        "b_cls": p["b_cls"],
    }


# -----------------------------------------------------------------------------
# Pure-JAX reference mirroring the torch module (bf16 matmul operands, f32 acc,
# f32 gate elementwise — same operand precision as the kernels).
# -----------------------------------------------------------------------------
def reference_forward(word_embs, obj_feats, p, num_words):
    bf16, f32 = jnp.bfloat16, jnp.float32
    mm = lambda a, w: jnp.dot(a.astype(bf16), w.astype(bf16), preferred_element_type=f32)
    h = jax.nn.relu(mm(obj_feats, p["w_map"]) + p["b_map"][0])
    outs = []
    for t in range(num_words - 1):
        x = word_embs[:, t]
        r = jax.nn.sigmoid(mm(x, p["w_ir"]) + p["b_ir"][0] + mm(h, p["w_hr"]) + p["b_hr"][0])
        z = jax.nn.sigmoid(mm(x, p["w_iz"]) + p["b_iz"][0] + mm(h, p["w_hz"]) + p["b_hz"][0])
        n = jnp.tanh(mm(x, p["w_in"]) + p["b_in"][0] + r * (mm(h, p["w_hn"]) + p["b_hn"][0]))
        h = (1.0 - z) * n + z * h
        outs.append(mm(h, p["w_cls"]) + p["b_cls"][0])
    return jnp.stack(outs, axis=1)


if __name__ == "__main__":
    # Small but hardware-aligned shapes (E, V multiples of 128).
    B = 8            # batch_size
    T = 8            # max description length in lang_feat
    FEAT = 32        # feat_size (matches module default)
    EMB = 128        # emb_size == GRU hidden size
    VOCAB = 256      # num_vocabs
    NUM_WORDS = 8    # des_lens.max()

    key = jax.random.PRNGKey(0)
    k_w, k_o, k_p = jax.random.split(key, 3)

    word_embs = jax.random.normal(k_w, (B, T, EMB), dtype=jnp.float32)   # lang_feat
    obj_feats = jax.random.normal(k_o, (B, FEAT), dtype=jnp.float32)     # select_feats
    raw_params = init_params(k_p, FEAT, EMB, VOCAB)
    packed_params = pack_params(raw_params)

    ref = reference_forward(word_embs, obj_feats, raw_params, NUM_WORDS)

    # Fused path (default for small vocab).
    lang_cap = caption_forward(word_embs, obj_feats, packed_params, NUM_WORDS)
    lang_cap = jax.block_until_ready(lang_cap)
    assert lang_cap.shape == (B, NUM_WORDS - 1, VOCAB)
    assert jnp.allclose(lang_cap, ref, atol=2e-3, rtol=2e-3), \
        float(jnp.max(jnp.abs(lang_cap - ref)))

    # Split path (bf16 h_states + vocab-tiled classifier), exercised for coverage.
    lang_cap_split = caption_forward(word_embs, obj_feats, packed_params, NUM_WORDS,
                                     force_split=True)
    lang_cap_split = jax.block_until_ready(lang_cap_split)
    assert lang_cap_split.shape == (B, NUM_WORDS - 1, VOCAB)
    assert jnp.allclose(lang_cap_split, ref, atol=2e-3, rtol=2e-3), \
        float(jnp.max(jnp.abs(lang_cap_split - ref)))

    print("KERNEL_OK")
</pallas_src>

<mosaic_0001>
module attributes {stable_mosaic.version = 11 : i64} {
  func.func @_fused_caption_kernel(%arg0: i32, %arg1: memref<112x128xbf16, #tpu.memory_space<vmem>>, %arg2: memref<16x32xbf16, #tpu.memory_space<vmem>>, %arg3: memref<32x128xbf16, #tpu.memory_space<vmem>>, %arg4: memref<1x128xf32, #tpu.memory_space<vmem>>, %arg5: memref<128x384xbf16, #tpu.memory_space<vmem>>, %arg6: memref<1x384xf32, #tpu.memory_space<vmem>>, %arg7: memref<128x384xbf16, #tpu.memory_space<vmem>>, %arg8: memref<1x128xf32, #tpu.memory_space<vmem>>, %arg9: memref<128x256xbf16, #tpu.memory_space<vmem>>, %arg10: memref<1x256xf32, #tpu.memory_space<vmem>>, %arg11: memref<16x1792xf32, #tpu.memory_space<vmem>>, %arg12: memref<112x384xf32, #tpu.memory_space<vmem>>) attributes {dimension_semantics = [#tpu.dimension_semantics<arbitrary>], iteration_bounds = array<i64: 1>, scalar_prefetch = 0 : i64, scratch_operands = 1 : i64, tpu.core_type = #tpu.core_type<tc>, window_params = [{pipeline_mode = #tpu.pipeline_mode<synchronous>, transform_indices = @transform_0, window_bounds = array<i64: 112, 128>}, {pipeline_mode = #tpu.pipeline_mode<synchronous>, transform_indices = @transform_1, window_bounds = array<i64: 16, 32>}, {pipeline_mode = #tpu.pipeline_mode<synchronous>, transform_indices = @transform_2, window_bounds = array<i64: 32, 128>}, {pipeline_mode = #tpu.pipeline_mode<synchronous>, transform_indices = @transform_3, window_bounds = array<i64: 1, 128>}, {pipeline_mode = #tpu.pipeline_mode<synchronous>, transform_indices = @transform_4, window_bounds = array<i64: 128, 384>}, {pipeline_mode = #tpu.pipeline_mode<synchronous>, transform_indices = @transform_5, window_bounds = array<i64: 1, 384>}, {pipeline_mode = #tpu.pipeline_mode<synchronous>, transform_indices = @transform_6, window_bounds = array<i64: 128, 384>}, {pipeline_mode = #tpu.pipeline_mode<synchronous>, transform_indices = @transform_7, window_bounds = array<i64: 1, 128>}, {pipeline_mode = #tpu.pipeline_mode<synchronous>, transform_indices = @transform_8, window_bounds = array<i64: 128, 256>}, {pipeline_mode = #tpu.pipeline_mode<synchronous>, transform_indices = @transform_9, window_bounds = array<i64: 1, 256>}, {pipeline_mode = #tpu.pipeline_mode<synchronous>, transform_indices = @transform_10, window_bounds = array<i64: 16, 1792>}]} {
    %c0 = arith.constant 0 : index
    %c0_0 = arith.constant 0 : index
    %0 = vector.load %arg2[%c0, %c0_0] : memref<16x32xbf16, #tpu.memory_space<vmem>>, vector<16x32xbf16>
    %c0_1 = arith.constant 0 : index
    %c0_2 = arith.constant 0 : index
    %1 = vector.load %arg3[%c0_1, %c0_2] : memref<32x128xbf16, #tpu.memory_space<vmem>>, vector<32x128xbf16>
    %cst = arith.constant dense<0.000000e+00> : vector<16x128xf32>
    %2 = tpu.matmul %0, %1, %cst {dimension_numbers = #tpu.dot_dimension_numbers<[1], [0], [0], [1], [0, 0, 1, 1], [], []>} : vector<16x32xbf16>, vector<32x128xbf16>, vector<16x128xf32> -> vector<16x128xf32>
    %c0_3 = arith.constant 0 : index
    %c0_4 = arith.constant 0 : index
    %3 = vector.load %arg4[%c0_3, %c0_4] : memref<1x128xf32, #tpu.memory_space<vmem>>, vector<1x128xf32>
    %4 = vector.broadcast %3 : vector<1x128xf32> to vector<16x128xf32>
    %5 = arith.addf %2, %4 : vector<16x128xf32>
    %cst_5 = arith.constant 0.000000e+00 : f32
    %6 = vector.broadcast %cst_5 : f32 to vector<16x128xf32>
    %7 = arith.maximumf %5, %6 : vector<16x128xf32>
    %c0_6 = arith.constant 0 : index
    %c0_7 = arith.constant 0 : index
    %8 = vector.load %arg1[%c0_6, %c0_7] : memref<112x128xbf16, #tpu.memory_space<vmem>>, vector<112x128xbf16>
    %c0_8 = arith.constant 0 : index
    %c0_9 = arith.constant 0 : index
    %9 = vector.load %arg5[%c0_8, %c0_9] : memref<128x384xbf16, #tpu.memory_space<vmem>>, vector<128x384xbf16>
    %cst_10 = arith.constant dense<0.000000e+00> : vector<112x384xf32>
    %10 = tpu.matmul %8, %9, %cst_10 {dimension_numbers = #tpu.dot_dimension_numbers<[1], [0], [0], [1], [0, 0, 1, 1], [], []>} : vector<112x128xbf16>, vector<128x384xbf16>, vector<112x384xf32> -> vector<112x384xf32>
    %c0_11 = arith.constant 0 : index
    %c0_12 = arith.constant 0 : index
    %11 = vector.load %arg6[%c0_11, %c0_12] : memref<1x384xf32, #tpu.memory_space<vmem>>, vector<1x384xf32>
    %12 = vector.broadcast %11 : vector<1x384xf32> to vector<112x384xf32>
    %13 = arith.addf %10, %12 : vector<112x384xf32>
    %c0_13 = arith.constant 0 : index
    %c0_14 = arith.constant 0 : index
    %14 = vector.load %arg12[%c0_13, %c0_14] : memref<112x384xf32, #tpu.memory_space<vmem>>, vector<112x384xf32>
    tpu.vector_store %arg12[%c0_13, %c0_14], %13 {strides = array<i32>} : memref<112x384xf32, #tpu.memory_space<vmem>>, vector<112x384xf32>,
    %c0_i32 = arith.constant 0 : i32
    %c16_i32 = arith.constant 16 : i32
    %15 = arith.muli %c0_i32, %c16_i32 : i32
    %16 = tpu.assume_multiple %15, 16 : i32
    %17 = arith.index_cast %16 : i32 to index
    %c0_15 = arith.constant 0 : index
    %18 = vector.load %arg12[%17, %c0_15] : memref<112x384xf32, #tpu.memory_space<vmem>>, vector<16x384xf32>
    %19 = arith.truncf %7 : vector<16x128xf32> to vector<16x128xbf16>
    %c0_16 = arith.constant 0 : index
    %c0_17 = arith.constant 0 : index
    %20 = vector.load %arg7[%c0_16, %c0_17] : memref<128x384xbf16, #tpu.memory_space<vmem>>, vector<128x384xbf16>
    %cst_18 = arith.constant dense<0.000000e+00> : vector<16x384xf32>
    %21 = tpu.matmul %19, %20, %cst_18 {dimension_numbers = #tpu.dot_dimension_numbers<[1], [0], [0], [1], [0, 0, 1, 1], [], []>} : vector<16x128xbf16>, vector<128x384xbf16>, vector<16x384xf32> -> vector<16x384xf32>
    %22 = vector.extract_strided_slice %18 {offsets = [0, 0], sizes = [16, 128], strides = [1, 1]} : vector<16x384xf32> to vector<16x128xf32>
    %23 = vector.extract_strided_slice %21 {offsets = [0, 0], sizes = [16, 128], strides = [1, 1]} : vector<16x384xf32> to vector<16x128xf32>
    %24 = arith.addf %22, %23 : vector<16x128xf32>
    %25 = arith.negf %24 : vector<16x128xf32>
    %26 = math.exp %25 : vector<16x128xf32>
    %cst_19 = arith.constant 1.000000e+00 : f32
    %27 = vector.broadcast %cst_19 : f32 to vector<16x128xf32>
    %28 = arith.addf %27, %26 : vector<16x128xf32>
    %29 = arith.divf %27, %28 : vector<16x128xf32>
    %30 = vector.extract_strided_slice %18 {offsets = [0, 128], sizes = [16, 128], strides = [1, 1]} : vector<16x384xf32> to vector<16x128xf32>
    %31 = vector.extract_strided_slice %21 {offsets = [0, 128], sizes = [16, 128], strides = [1, 1]} : vector<16x384xf32> to vector<16x128xf32>
    %32 = arith.addf %30, %31 : vector<16x128xf32>
    %33 = arith.negf %32 : vector<16x128xf32>
    %34 = math.exp %33 : vector<16x128xf32>
    %cst_20 = arith.constant 1.000000e+00 : f32
    %35 = vector.broadcast %cst_20 : f32 to vector<16x128xf32>
    %36 = arith.addf %35, %34 : vector<16x128xf32>
    %37 = arith.divf %35, %36 : vector<16x128xf32>
    %38 = vector.extract_strided_slice %18 {offsets = [0, 256], sizes = [16, 128], strides = [1, 1]} : vector<16x384xf32> to vector<16x128xf32>
    %39 = vector.extract_strided_slice %21 {offsets = [0, 256], sizes = [16, 128], strides = [1, 1]} : vector<16x384xf32> to vector<16x128xf32>
    %c0_21 = arith.constant 0 : index
    %c0_22 = arith.constant 0 : index
    %40 = vector.load %arg8[%c0_21, %c0_22] : memref<1x128xf32, #tpu.memory_space<vmem>>, vector<1x128xf32>
    %41 = vector.broadcast %40 : vector<1x128xf32> to vector<16x128xf32>
    %42 = arith.addf %39, %41 : vector<16x128xf32>
    %43 = arith.mulf %29, %42 : vector<16x128xf32>
    %44 = arith.addf %38, %43 : vector<16x128xf32>
    %45 = math.tanh %44 : vector<16x128xf32>
    %cst_23 = arith.constant 1.000000e+00 : f32
    %46 = vector.broadcast %cst_23 : f32 to vector<16x128xf32>
    %47 = arith.subf %46, %37 : vector<16x128xf32>
    %48 = arith.mulf %47, %45 : vector<16x128xf32>
    %49 = arith.mulf %37, %7 : vector<16x128xf32>
    %50 = arith.addf %48, %49 : vector<16x128xf32>
    %51 = arith.truncf %50 : vector<16x128xf32> to vector<16x128xbf16>
    %c0_24 = arith.constant 0 : index
    %c0_25 = arith.constant 0 : index
    %52 = vector.load %arg9[%c0_24, %c0_25] : memref<128x256xbf16, #tpu.memory_space<vmem>>, vector<128x256xbf16>
    %cst_26 = arith.constant dense<0.000000e+00> : vector<16x256xf32>
    %53 = tpu.matmul %51, %52, %cst_26 {dimension_numbers = #tpu.dot_dimension_numbers<[1], [0], [0], [1], [0, 0, 1, 1], [], []>} : vector<16x128xbf16>, vector<128x256xbf16>, vector<16x256xf32> -> vector<16x256xf32>
    %c0_27 = arith.constant 0 : index
    %c0_28 = arith.constant 0 : index
    %54 = vector.load %arg10[%c0_27, %c0_28] : memref<1x256xf32, #tpu.memory_space<vmem>>, vector<1x256xf32>
    %55 = vector.broadcast %54 : vector<1x256xf32> to vector<16x256xf32>
    %56 = arith.addf %53, %55 : vector<16x256xf32>
    %c256_i32 = arith.constant 256 : i32
    %57 = arith.muli %c0_i32, %c256_i32 : i32
    %58 = tpu.assume_multiple %57, 128 : i32
    %c0_29 = arith.constant 0 : index
    %59 = arith.index_cast %58 : i32 to index
    %60 = vector.load %arg11[%c0_29, %59] : memref<16x1792xf32, #tpu.memory_space<vmem>>, vector<16x256xf32>
    tpu.vector_store %arg11[%c0_29, %59], %56 {strides = array<i32>} : memref<16x1792xf32, #tpu.memory_space<vmem>>, vector<16x256xf32>,
    %c1_i32 = arith.constant 1 : i32
    %c16_i32_30 = arith.constant 16 : i32
    %61 = arith.muli %c1_i32, %c16_i32_30 : i32
    %62 = tpu.assume_multiple %61, 16 : i32
    %63 = arith.index_cast %62 : i32 to index
    %c0_31 = arith.constant 0 : index
    %64 = vector.load %arg12[%63, %c0_31] : memref<112x384xf32, #tpu.memory_space<vmem>>, vector<16x384xf32>
    %65 = arith.truncf %50 : vector<16x128xf32> to vector<16x128xbf16>
    %c0_32 = arith.constant 0 : index
    %c0_33 = arith.constant 0 : index
    %66 = vector.load %arg7[%c0_32, %c0_33] : memref<128x384xbf16, #tpu.memory_space<vmem>>, vector<128x384xbf16>
    %cst_34 = arith.constant dense<0.000000e+00> : vector<16x384xf32>
    %67 = tpu.matmul %65, %66, %cst_34 {dimension_numbers = #tpu.dot_dimension_numbers<[1], [0], [0], [1], [0, 0, 1, 1], [], []>} : vector<16x128xbf16>, vector<128x384xbf16>, vector<16x384xf32> -> vector<16x384xf32>
    %68 = vector.extract_strided_slice %64 {offsets = [0, 0], sizes = [16, 128], strides = [1, 1]} : vector<16x384xf32> to vector<16x128xf32>
    %69 = vector.extract_strided_slice %67 {offsets = [0, 0], sizes = [16, 128], strides = [1, 1]} : vector<16x384xf32> to vector<16x128xf32>
    %70 = arith.addf %68, %69 : vector<16x128xf32>
    %71 = arith.negf %70 : vector<16x128xf32>
    %72 = math.exp %71 : vector<16x128xf32>
    %cst_35 = arith.constant 1.000000e+00 : f32
    %73 = vector.broadcast %cst_35 : f32 to vector<16x128xf32>
    %74 = arith.addf %73, %72 : vector<16x128xf32>
    %75 = arith.divf %73, %74 : vector<16x128xf32>
    %76 = vector.extract_strided_slice %64 {offsets = [0, 128], sizes = [16, 128], strides = [1, 1]} : vector<16x384xf32> to vector<16x128xf32>
    %77 = vector.extract_strided_slice %67 {offsets = [0, 128], sizes = [16, 128], strides = [1, 1]} : vector<16x384xf32> to vector<16x128xf32>
    %78 = arith.addf %76, %77 : vector<16x128xf32>
    %79 = arith.negf %78 : vector<16x128xf32>
    %80 = math.exp %79 : vector<16x128xf32>
    %cst_36 = arith.constant 1.000000e+00 : f32
    %81 = vector.broadcast %cst_36 : f32 to vector<16x128xf32>
    %82 = arith.addf %81, %80 : vector<16x128xf32>
    %83 = arith.divf %81, %82 : vector<16x128xf32>
    %84 = vector.extract_strided_slice %64 {offsets = [0, 256], sizes = [16, 128], strides = [1, 1]} : vector<16x384xf32> to vector<16x128xf32>
    %85 = vector.extract_strided_slice %67 {offsets = [0, 256], sizes = [16, 128], strides = [1, 1]} : vector<16x384xf32> to vector<16x128xf32>
    %c0_37 = arith.constant 0 : index
    %c0_38 = arith.constant 0 : index
    %86 = vector.load %arg8[%c0_37, %c0_38] : memref<1x128xf32, #tpu.memory_space<vmem>>, vector<1x128xf32>
    %87 = vector.broadcast %86 : vector<1x128xf32> to vector<16x128xf32>
    %88 = arith.addf %85, %87 : vector<16x128xf32>
    %89 = arith.mulf %75, %88 : vector<16x128xf32>
    %90 = arith.addf %84, %89 : vector<16x128xf32>
    %91 = math.tanh %90 : vector<16x128xf32>
    %cst_39 = arith.constant 1.000000e+00 : f32
    %92 = vector.broadcast %cst_39 : f32 to vector<16x128xf32>
    %93 = arith.subf %92, %83 : vector<16x128xf32>
    %94 = arith.mulf %93, %91 : vector<16x128xf32>
    %95 = arith.mulf %83, %50 : vector<16x128xf32>
    %96 = arith.addf %94, %95 : vector<16x128xf32>
    %97 = arith.truncf %96 : vector<16x128xf32> to vector<16x128xbf16>
    %c0_40 = arith.constant 0 : index
    %c0_41 = arith.constant 0 : index
    %98 = vector.load %arg9[%c0_40, %c0_41] : memref<128x256xbf16, #tpu.memory_space<vmem>>, vector<128x256xbf16>
    %cst_42 = arith.constant dense<0.000000e+00> : vector<16x256xf32>
    %99 = tpu.matmul %97, %98, %cst_42 {dimension_numbers = #tpu.dot_dimension_numbers<[1], [0], [0], [1], [0, 0, 1, 1], [], []>} : vector<16x128xbf16>, vector<128x256xbf16>, vector<16x256xf32> -> vector<16x256xf32>
    %c0_43 = arith.constant 0 : index
    %c0_44 = arith.constant 0 : index
    %100 = vector.load %arg10[%c0_43, %c0_44] : memref<1x256xf32, #tpu.memory_space<vmem>>, vector<1x256xf32>
    %101 = vector.broadcast %100 : vector<1x256xf32> to vector<16x256xf32>
    %102 = arith.addf %99, %101 : vector<16x256xf32>
    %c256_i32_45 = arith.constant 256 : i32
    %103 = arith.muli %c1_i32, %c256_i32_45 : i32
    %104 = tpu.assume_multiple %103, 128 : i32
    %c0_46 = arith.constant 0 : index
    %105 = arith.index_cast %104 : i32 to index
    %106 = vector.load %arg11[%c0_46, %105] : memref<16x1792xf32, #tpu.memory_space<vmem>>, vector<16x256xf32>
    tpu.vector_store %arg11[%c0_46, %105], %102 {strides = array<i32>} : memref<16x1792xf32, #tpu.memory_space<vmem>>, vector<16x256xf32>,
    %c2_i32 = arith.constant 2 : i32
    %c16_i32_47 = arith.constant 16 : i32
    %107 = arith.muli %c2_i32, %c16_i32_47 : i32
    %108 = tpu.assume_multiple %107, 16 : i32
    %109 = arith.index_cast %108 : i32 to index
    %c0_48 = arith.constant 0 : index
    %110 = vector.load %arg12[%109, %c0_48] : memref<112x384xf32, #tpu.memory_space<vmem>>, vector<16x384xf32>
    %111 = arith.truncf %96 : vector<16x128xf32> to vector<16x128xbf16>
    %c0_49 = arith.constant 0 : index
    %c0_50 = arith.constant 0 : index
    %112 = vector.load %arg7[%c0_49, %c0_50] : memref<128x384xbf16, #tpu.memory_space<vmem>>, vector<128x384xbf16>
    %cst_51 = arith.constant dense<0.000000e+00> : vector<16x384xf32>
    %113 = tpu.matmul %111, %112, %cst_51 {dimension_numbers = #tpu.dot_dimension_numbers<[1], [0], [0], [1], [0, 0, 1, 1], [], []>} : vector<16x128xbf16>, vector<128x384xbf16>, vector<16x384xf32> -> vector<16x384xf32>
    %114 = vector.extract_strided_slice %110 {offsets = [0, 0], sizes = [16, 128], strides = [1, 1]} : vector<16x384xf32> to vector<16x128xf32>
    %115 = vector.extract_strided_slice %113 {offsets = [0, 0], sizes = [16, 128], strides = [1, 1]} : vector<16x384xf32> to vector<16x128xf32>
    %116 = arith.addf %114, %115 : vector<16x128xf32>
    %117 = arith.negf %116 : vector<16x128xf32>
    %118 = math.exp %117 : vector<16x128xf32>
    %cst_52 = arith.constant 1.000000e+00 : f32
    %119 = vector.broadcast %cst_52 : f32 to vector<16x128xf32>
    %120 = arith.addf %119, %118 : vector<16x128xf32>
    %121 = arith.divf %119, %120 : vector<16x128xf32>
    %122 = vector.extract_strided_slice %110 {offsets = [0, 128], sizes = [16, 128], strides = [1, 1]} : vector<16x384xf32> to vector<16x128xf32>
    %123 = vector.extract_strided_slice %113 {offsets = [0, 128], sizes = [16, 128], strides = [1, 1]} : vector<16x384xf32> to vector<16x128xf32>
    %124 = arith.addf %122, %123 : vector<16x128xf32>
    %125 = arith.negf %124 : vector<16x128xf32>
    %126 = math.exp %125 : vector<16x128xf32>
    %cst_53 = arith.constant 1.000000e+00 : f32
    %127 = vector.broadcast %cst_53 : f32 to vector<16x128xf32>
    %128 = arith.addf %127, %126 : vector<16x128xf32>
    %129 = arith.divf %127, %128 : vector<16x128xf32>
    %130 = vector.extract_strided_slice %110 {offsets = [0, 256], sizes = [16, 128], strides = [1, 1]} : vector<16x384xf32> to vector<16x128xf32>
    %131 = vector.extract_strided_slice %113 {offsets = [0, 256], sizes = [16, 128], strides = [1, 1]} : vector<16x384xf32> to vector<16x128xf32>
    %c0_54 = arith.constant 0 : index
    %c0_55 = arith.constant 0 : index
    %132 = vector.load %arg8[%c0_54, %c0_55] : memref<1x128xf32, #tpu.memory_space<vmem>>, vector<1x128xf32>
    %133 = vector.broadcast %132 : vector<1x128xf32> to vector<16x128xf32>
    %134 = arith.addf %131, %133 : vector<16x128xf32>
    %135 = arith.mulf %121, %134 : vector<16x128xf32>
    %136 = arith.addf %130, %135 : vector<16x128xf32>
    %137 = math.tanh %136 : vector<16x128xf32>
    %cst_56 = arith.constant 1.000000e+00 : f32
    %138 = vector.broadcast %cst_56 : f32 to vector<16x128xf32>
    %139 = arith.subf %138, %129 : vector<16x128xf32>
    %140 = arith.mulf %139, %137 : vector<16x128xf32>
    %141 = arith.mulf %129, %96 : vector<16x128xf32>
    %142 = arith.addf %140, %141 : vector<16x128xf32>
    %143 = arith.truncf %142 : vector<16x128xf32> to vector<16x128xbf16>
    %c0_57 = arith.constant 0 : index
    %c0_58 = arith.constant 0 : index
    %144 = vector.load %arg9[%c0_57, %c0_58] : memref<128x256xbf16, #tpu.memory_space<vmem>>, vector<128x256xbf16>
    %cst_59 = arith.constant dense<0.000000e+00> : vector<16x256xf32>
    %145 = tpu.matmul %143, %144, %cst_59 {dimension_numbers = #tpu.dot_dimension_numbers<[1], [0], [0], [1], [0, 0, 1, 1], [], []>} : vector<16x128xbf16>, vector<128x256xbf16>, vector<16x256xf32> -> vector<16x256xf32>
    %c0_60 = arith.constant 0 : index
    %c0_61 = arith.constant 0 : index
    %146 = vector.load %arg10[%c0_60, %c0_61] : memref<1x256xf32, #tpu.memory_space<vmem>>, vector<1x256xf32>
    %147 = vector.broadcast %146 : vector<1x256xf32> to vector<16x256xf32>
    %148 = arith.addf %145, %147 : vector<16x256xf32>
    %c256_i32_62 = arith.constant 256 : i32
    %149 = arith.muli %c2_i32, %c256_i32_62 : i32
    %150 = tpu.assume_multiple %149, 128 : i32
    %c0_63 = arith.constant 0 : index
    %151 = arith.index_cast %150 : i32 to index
    %152 = vector.load %arg11[%c0_63, %151] : memref<16x1792xf32, #tpu.memory_space<vmem>>, vector<16x256xf32>
    tpu.vector_store %arg11[%c0_63, %151], %148 {strides = array<i32>} : memref<16x1792xf32, #tpu.memory_space<vmem>>, vector<16x256xf32>,
    %c3_i32 = arith.constant 3 : i32
    %c16_i32_64 = arith.constant 16 : i32
    %153 = arith.muli %c3_i32, %c16_i32_64 : i32
    %154 = tpu.assume_multiple %153, 16 : i32
    %155 = arith.index_cast %154 : i32 to index
    %c0_65 = arith.constant 0 : index
    %156 = vector.load %arg12[%155, %c0_65] : memref<112x384xf32, #tpu.memory_space<vmem>>, vector<16x384xf32>
    %157 = arith.truncf %142 : vector<16x128xf32> to vector<16x128xbf16>
    %c0_66 = arith.constant 0 : index
    %c0_67 = arith.constant 0 : index
    %158 = vector.load %arg7[%c0_66, %c0_67] : memref<128x384xbf16, #tpu.memory_space<vmem>>, vector<128x384xbf16>
    %cst_68 = arith.constant dense<0.000000e+00> : vector<16x384xf32>
    %159 = tpu.matmul %157, %158, %cst_68 {dimension_numbers = #tpu.dot_dimension_numbers<[1], [0], [0], [1], [0, 0, 1, 1], [], []>} : vector<16x128xbf16>, vector<128x384xbf16>, vector<16x384xf32> -> vector<16x384xf32>
    %160 = vector.extract_strided_slice %156 {offsets = [0, 0], sizes = [16, 128], strides = [1, 1]} : vector<16x384xf32> to vector<16x128xf32>
    %161 = vector.extract_strided_slice %159 {offsets = [0, 0], sizes = [16, 128], strides = [1, 1]} : vector<16x384xf32> to vector<16x128xf32>
    %162 = arith.addf %160, %161 : vector<16x128xf32>
    %163 = arith.negf %162 : vector<16x128xf32>
    %164 = math.exp %163 : vector<16x128xf32>
    %cst_69 = arith.constant 1.000000e+00 : f32
    %165 = vector.broadcast %cst_69 : f32 to vector<16x128xf32>
    %166 = arith.addf %165, %164 : vector<16x128xf32>
    %167 = arith.divf %165, %166 : vector<16x128xf32>
    %168 = vector.extract_strided_slice %156 {offsets = [0, 128], sizes = [16, 128], strides = [1, 1]} : vector<16x384xf32> to vector<16x128xf32>
    %169 = vector.extract_strided_slice %159 {offsets = [0, 128], sizes = [16, 128], strides = [1, 1]} : vector<16x384xf32> to vector<16x128xf32>
    %170 = arith.addf %168, %169 : vector<16x128xf32>
    %171 = arith.negf %170 : vector<16x128xf32>
    %172 = math.exp %171 : vector<16x128xf32>
    %cst_70 = arith.constant 1.000000e+00 : f32
    %173 = vector.broadcast %cst_70 : f32 to vector<16x128xf32>
    %174 = arith.addf %173, %172 : vector<16x128xf32>
    %175 = arith.divf %173, %174 : vector<16x128xf32>
    %176 = vector.extract_strided_slice %156 {offsets = [0, 256], sizes = [16, 128], strides = [1, 1]} : vector<16x384xf32> to vector<16x128xf32>
    %177 = vector.extract_strided_slice %159 {offsets = [0, 256], sizes = [16, 128], strides = [1, 1]} : vector<16x384xf32> to vector<16x128xf32>
    %c0_71 = arith.constant 0 : index
    %c0_72 = arith.constant 0 : index
    %178 = vector.load %arg8[%c0_71, %c0_72] : memref<1x128xf32, #tpu.memory_space<vmem>>, vector<1x128xf32>
    %179 = vector.broadcast %178 : vector<1x128xf32> to vector<16x128xf32>
    %180 = arith.addf %177, %179 : vector<16x128xf32>
    %181 = arith.mulf %167, %180 : vector<16x128xf32>
    %182 = arith.addf %176, %181 : vector<16x128xf32>
    %183 = math.tanh %182 : vector<16x128xf32>
    %cst_73 = arith.constant 1.000000e+00 : f32
    %184 = vector.broadcast %cst_73 : f32 to vector<16x128xf32>
    %185 = arith.subf %184, %175 : vector<16x128xf32>
    %186 = arith.mulf %185, %183 : vector<16x128xf32>
    %187 = arith.mulf %175, %142 : vector<16x128xf32>
    %188 = arith.addf %186, %187 : vector<16x128xf32>
    %189 = arith.truncf %188 : vector<16x128xf32> to vector<16x128xbf16>
    %c0_74 = arith.constant 0 : index
    %c0_75 = arith.constant 0 : index
    %190 = vector.load %arg9[%c0_74, %c0_75] : memref<128x256xbf16, #tpu.memory_space<vmem>>, vector<128x256xbf16>
    %cst_76 = arith.constant dense<0.000000e+00> : vector<16x256xf32>
    %191 = tpu.matmul %189, %190, %cst_76 {dimension_numbers = #tpu.dot_dimension_numbers<[1], [0], [0], [1], [0, 0, 1, 1], [], []>} : vector<16x128xbf16>, vector<128x256xbf16>, vector<16x256xf32> -> vector<16x256xf32>
    %c0_77 = arith.constant 0 : index
    %c0_78 = arith.constant 0 : index
    %192 = vector.load %arg10[%c0_77, %c0_78] : memref<1x256xf32, #tpu.memory_space<vmem>>, vector<1x256xf32>
    %193 = vector.broadcast %192 : vector<1x256xf32> to vector<16x256xf32>
    %194 = arith.addf %191, %193 : vector<16x256xf32>
    %c256_i32_79 = arith.constant 256 : i32
    %195 = arith.muli %c3_i32, %c256_i32_79 : i32
    %196 = tpu.assume_multiple %195, 128 : i32
    %c0_80 = arith.constant 0 : index
    %197 = arith.index_cast %196 : i32 to index
    %198 = vector.load %arg11[%c0_80, %197] : memref<16x1792xf32, #tpu.memory_space<vmem>>, vector<16x256xf32>
    tpu.vector_store %arg11[%c0_80, %197], %194 {strides = array<i32>} : memref<16x1792xf32, #tpu.memory_space<vmem>>, vector<16x256xf32>,
    %c4_i32 = arith.constant 4 : i32
    %c16_i32_81 = arith.constant 16 : i32
    %199 = arith.muli %c4_i32, %c16_i32_81 : i32
    %200 = tpu.assume_multiple %199, 16 : i32
    %201 = arith.index_cast %200 : i32 to index
    %c0_82 = arith.constant 0 : index
    %202 = vector.load %arg12[%201, %c0_82] : memref<112x384xf32, #tpu.memory_space<vmem>>, vector<16x384xf32>
    %203 = arith.truncf %188 : vector<16x128xf32> to vector<16x128xbf16>
    %c0_83 = arith.constant 0 : index
    %c0_84 = arith.constant 0 : index
    %204 = vector.load %arg7[%c0_83, %c0_84] : memref<128x384xbf16, #tpu.memory_space<vmem>>, vector<128x384xbf16>
    %cst_85 = arith.constant dense<0.000000e+00> : vector<16x384xf32>
    %205 = tpu.matmul %203, %204, %cst_85 {dimension_numbers = #tpu.dot_dimension_numbers<[1], [0], [0], [1], [0, 0, 1, 1], [], []>} : vector<16x128xbf16>, vector<128x384xbf16>, vector<16x384xf32> -> vector<16x384xf32>
    %206 = vector.extract_strided_slice %202 {offsets = [0, 0], sizes = [16, 128], strides = [1, 1]} : vector<16x384xf32> to vector<16x128xf32>
    %207 = vector.extract_strided_slice %205 {offsets = [0, 0], sizes = [16, 128], strides = [1, 1]} : vector<16x384xf32> to vector<16x128xf32>
    %208 = arith.addf %206, %207 : vector<16x128xf32>
    %209 = arith.negf %208 : vector<16x128xf32>
    %210 = math.exp %209 : vector<16x128xf32>
    %cst_86 = arith.constant 1.000000e+00 : f32
    %211 = vector.broadcast %cst_86 : f32 to vector<16x128xf32>
    %212 = arith.addf %211, %210 : vector<16x128xf32>
    %213 = arith.divf %211, %212 : vector<16x128xf32>
    %214 = vector.extract_strided_slice %202 {offsets = [0, 128], sizes = [16, 128], strides = [1, 1]} : vector<16x384xf32> to vector<16x128xf32>
    %215 = vector.extract_strided_slice %205 {offsets = [0, 128], sizes = [16, 128], strides = [1, 1]} : vector<16x384xf32> to vector<16x128xf32>
    %216 = arith.addf %214, %215 : vector<16x128xf32>
    %217 = arith.negf %216 : vector<16x128xf32>
    %218 = math.exp %217 : vector<16x128xf32>
    %cst_87 = arith.constant 1.000000e+00 : f32
    %219 = vector.broadcast %cst_87 : f32 to vector<16x128xf32>
    %220 = arith.addf %219, %218 : vector<16x128xf32>
    %221 = arith.divf %219, %220 : vector<16x128xf32>
    %222 = vector.extract_strided_slice %202 {offsets = [0, 256], sizes = [16, 128], strides = [1, 1]} : vector<16x384xf32> to vector<16x128xf32>
    %223 = vector.extract_strided_slice %205 {offsets = [0, 256], sizes = [16, 128], strides = [1, 1]} : vector<16x384xf32> to vector<16x128xf32>
    %c0_88 = arith.constant 0 : index
    %c0_89 = arith.constant 0 : index
    %224 = vector.load %arg8[%c0_88, %c0_89] : memref<1x128xf32, #tpu.memory_space<vmem>>, vector<1x128xf32>
    %225 = vector.broadcast %224 : vector<1x128xf32> to vector<16x128xf32>
    %226 = arith.addf %223, %225 : vector<16x128xf32>
    %227 = arith.mulf %213, %226 : vector<16x128xf32>
    %228 = arith.addf %222, %227 : vector<16x128xf32>
    %229 = math.tanh %228 : vector<16x128xf32>
    %cst_90 = arith.constant 1.000000e+00 : f32
    %230 = vector.broadcast %cst_90 : f32 to vector<16x128xf32>
    %231 = arith.subf %230, %221 : vector<16x128xf32>
    %232 = arith.mulf %231, %229 : vector<16x128xf32>
    %233 = arith.mulf %221, %188 : vector<16x128xf32>
    %234 = arith.addf %232, %233 : vector<16x128xf32>
    %235 = arith.truncf %234 : vector<16x128xf32> to vector<16x128xbf16>
    %c0_91 = arith.constant 0 : index
    %c0_92 = arith.constant 0 : index
    %236 = vector.load %arg9[%c0_91, %c0_92] : memref<128x256xbf16, #tpu.memory_space<vmem>>, vector<128x256xbf16>
    %cst_93 = arith.constant dense<0.000000e+00> : vector<16x256xf32>
    %237 = tpu.matmul %235, %236, %cst_93 {dimension_numbers = #tpu.dot_dimension_numbers<[1], [0], [0], [1], [0, 0, 1, 1], [], []>} : vector<16x128xbf16>, vector<128x256xbf16>, vector<16x256xf32> -> vector<16x256xf32>
    %c0_94 = arith.constant 0 : index
    %c0_95 = arith.constant 0 : index
    %238 = vector.load %arg10[%c0_94, %c0_95] : memref<1x256xf32, #tpu.memory_space<vmem>>, vector<1x256xf32>
    %239 = vector.broadcast %238 : vector<1x256xf32> to vector<16x256xf32>
    %240 = arith.addf %237, %239 : vector<16x256xf32>
    %c256_i32_96 = arith.constant 256 : i32
    %241 = arith.muli %c4_i32, %c256_i32_96 : i32
    %242 = tpu.assume_multiple %241, 128 : i32
    %c0_97 = arith.constant 0 : index
    %243 = arith.index_cast %242 : i32 to index
    %244 = vector.load %arg11[%c0_97, %243] : memref<16x1792xf32, #tpu.memory_space<vmem>>, vector<16x256xf32>
    tpu.vector_store %arg11[%c0_97, %243], %240 {strides = array<i32>} : memref<16x1792xf32, #tpu.memory_space<vmem>>, vector<16x256xf32>,
    %c5_i32 = arith.constant 5 : i32
    %c16_i32_98 = arith.constant 16 : i32
    %245 = arith.muli %c5_i32, %c16_i32_98 : i32
    %246 = tpu.assume_multiple %245, 16 : i32
    %247 = arith.index_cast %246 : i32 to index
    %c0_99 = arith.constant 0 : index
    %248 = vector.load %arg12[%247, %c0_99] : memref<112x384xf32, #tpu.memory_space<vmem>>, vector<16x384xf32>
    %249 = arith.truncf %234 : vector<16x128xf32> to vector<16x128xbf16>
    %c0_100 = arith.constant 0 : index
    %c0_101 = arith.constant 0 : index
    %250 = vector.load %arg7[%c0_100, %c0_101] : memref<128x384xbf16, #tpu.memory_space<vmem>>, vector<128x384xbf16>
    %cst_102 = arith.constant dense<0.000000e+00> : vector<16x384xf32>
    %251 = tpu.matmul %249, %250, %cst_102 {dimension_numbers = #tpu.dot_dimension_numbers<[1], [0], [0], [1], [0, 0, 1, 1], [], []>} : vector<16x128xbf16>, vector<128x384xbf16>, vector<16x384xf32> -> vector<16x384xf32>
    %252 = vector.extract_strided_slice %248 {offsets = [0, 0], sizes = [16, 128], strides = [1, 1]} : vector<16x384xf32> to vector<16x128xf32>
    %253 = vector.extract_strided_slice %251 {offsets = [0, 0], sizes = [16, 128], strides = [1, 1]} : vector<16x384xf32> to vector<16x128xf32>
    %254 = arith.addf %252, %253 : vector<16x128xf32>
    %255 = arith.negf %254 : vector<16x128xf32>
    %256 = math.exp %255 : vector<16x128xf32>
    %cst_103 = arith.constant 1.000000e+00 : f32
    %257 = vector.broadcast %cst_103 : f32 to vector<16x128xf32>
    %258 = arith.addf %257, %256 : vector<16x128xf32>
    %259 = arith.divf %257, %258 : vector<16x128xf32>
    %260 = vector.extract_strided_slice %248 {offsets = [0, 128], sizes = [16, 128], strides = [1, 1]} : vector<16x384xf32> to vector<16x128xf32>
    %261 = vector.extract_strided_slice %251 {offsets = [0, 128], sizes = [16, 128], strides = [1, 1]} : vector<16x384xf32> to vector<16x128xf32>
    %262 = arith.addf %260, %261 : vector<16x128xf32>
    %263 = arith.negf %262 : vector<16x128xf32>
    %264 = math.exp %263 : vector<16x128xf32>
    %cst_104 = arith.constant 1.000000e+00 : f32
    %265 = vector.broadcast %cst_104 : f32 to vector<16x128xf32>
    %266 = arith.addf %265, %264 : vector<16x128xf32>
    %267 = arith.divf %265, %266 : vector<16x128xf32>
    %268 = vector.extract_strided_slice %248 {offsets = [0, 256], sizes = [16, 128], strides = [1, 1]} : vector<16x384xf32> to vector<16x128xf32>
    %269 = vector.extract_strided_slice %251 {offsets = [0, 256], sizes = [16, 128], strides = [1, 1]} : vector<16x384xf32> to vector<16x128xf32>
    %c0_105 = arith.constant 0 : index
    %c0_106 = arith.constant 0 : index
    %270 = vector.load %arg8[%c0_105, %c0_106] : memref<1x128xf32, #tpu.memory_space<vmem>>, vector<1x128xf32>
    %271 = vector.broadcast %270 : vector<1x128xf32> to vector<16x128xf32>
    %272 = arith.addf %269, %271 : vector<16x128xf32>
    %273 = arith.mulf %259, %272 : vector<16x128xf32>
    %274 = arith.addf %268, %273 : vector<16x128xf32>
    %275 = math.tanh %274 : vector<16x128xf32>
    %cst_107 = arith.constant 1.000000e+00 : f32
    %276 = vector.broadcast %cst_107 : f32 to vector<16x128xf32>
    %277 = arith.subf %276, %267 : vector<16x128xf32>
    %278 = arith.mulf %277, %275 : vector<16x128xf32>
    %279 = arith.mulf %267, %234 : vector<16x128xf32>
    %280 = arith.addf %278, %279 : vector<16x128xf32>
    %281 = arith.truncf %280 : vector<16x128xf32> to vector<16x128xbf16>
    %c0_108 = arith.constant 0 : index
    %c0_109 = arith.constant 0 : index
    %282 = vector.load %arg9[%c0_108, %c0_109] : memref<128x256xbf16, #tpu.memory_space<vmem>>, vector<128x256xbf16>
    %cst_110 = arith.constant dense<0.000000e+00> : vector<16x256xf32>
    %283 = tpu.matmul %281, %282, %cst_110 {dimension_numbers = #tpu.dot_dimension_numbers<[1], [0], [0], [1], [0, 0, 1, 1], [], []>} : vector<16x128xbf16>, vector<128x256xbf16>, vector<16x256xf32> -> vector<16x256xf32>
    %c0_111 = arith.constant 0 : index
    %c0_112 = arith.constant 0 : index
    %284 = vector.load %arg10[%c0_111, %c0_112] : memref<1x256xf32, #tpu.memory_space<vmem>>, vector<1x256xf32>
    %285 = vector.broadcast %284 : vector<1x256xf32> to vector<16x256xf32>
    %286 = arith.addf %283, %285 : vector<16x256xf32>
    %c256_i32_113 = arith.constant 256 : i32
    %287 = arith.muli %c5_i32, %c256_i32_113 : i32
    %288 = tpu.assume_multiple %287, 128 : i32
    %c0_114 = arith.constant 0 : index
    %289 = arith.index_cast %288 : i32 to index
    %290 = vector.load %arg11[%c0_114, %289] : memref<16x1792xf32, #tpu.memory_space<vmem>>, vector<16x256xf32>
    tpu.vector_store %arg11[%c0_114, %289], %286 {strides = array<i32>} : memref<16x1792xf32, #tpu.memory_space<vmem>>, vector<16x256xf32>,
    %c6_i32 = arith.constant 6 : i32
    %c16_i32_115 = arith.constant 16 : i32
    %291 = arith.muli %c6_i32, %c16_i32_115 : i32
    %292 = tpu.assume_multiple %291, 16 : i32
    %293 = arith.index_cast %292 : i32 to index
    %c0_116 = arith.constant 0 : index
    %294 = vector.load %arg12[%293, %c0_116] : memref<112x384xf32, #tpu.memory_space<vmem>>, vector<16x384xf32>
    %295 = arith.truncf %280 : vector<16x128xf32> to vector<16x128xbf16>
    %c0_117 = arith.constant 0 : index
    %c0_118 = arith.constant 0 : index
    %296 = vector.load %arg7[%c0_117, %c0_118] : memref<128x384xbf16, #tpu.memory_space<vmem>>, vector<128x384xbf16>
    %cst_119 = arith.constant dense<0.000000e+00> : vector<16x384xf32>
    %297 = tpu.matmul %295, %296, %cst_119 {dimension_numbers = #tpu.dot_dimension_numbers<[1], [0], [0], [1], [0, 0, 1, 1], [], []>} : vector<16x128xbf16>, vector<128x384xbf16>, vector<16x384xf32> -> vector<16x384xf32>
    %298 = vector.extract_strided_slice %294 {offsets = [0, 0], sizes = [16, 128], strides = [1, 1]} : vector<16x384xf32> to vector<16x128xf32>
    %299 = vector.extract_strided_slice %297 {offsets = [0, 0], sizes = [16, 128], strides = [1, 1]} : vector<16x384xf32> to vector<16x128xf32>
    %300 = arith.addf %298, %299 : vector<16x128xf32>
    %301 = arith.negf %300 : vector<16x128xf32>
    %302 = math.exp %301 : vector<16x128xf32>
    %cst_120 = arith.constant 1.000000e+00 : f32
    %303 = vector.broadcast %cst_120 : f32 to vector<16x128xf32>
    %304 = arith.addf %303, %302 : vector<16x128xf32>
    %305 = arith.divf %303, %304 : vector<16x128xf32>
    %306 = vector.extract_strided_slice %294 {offsets = [0, 128], sizes = [16, 128], strides = [1, 1]} : vector<16x384xf32> to vector<16x128xf32>
    %307 = vector.extract_strided_slice %297 {offsets = [0, 128], sizes = [16, 128], strides = [1, 1]} : vector<16x384xf32> to vector<16x128xf32>
    %308 = arith.addf %306, %307 : vector<16x128xf32>
    %309 = arith.negf %308 : vector<16x128xf32>
    %310 = math.exp %309 : vector<16x128xf32>
    %cst_121 = arith.constant 1.000000e+00 : f32
    %311 = vector.broadcast %cst_121 : f32 to vector<16x128xf32>
    %312 = arith.addf %311, %310 : vector<16x128xf32>
    %313 = arith.divf %311, %312 : vector<16x128xf32>
    %314 = vector.extract_strided_slice %294 {offsets = [0, 256], sizes = [16, 128], strides = [1, 1]} : vector<16x384xf32> to vector<16x128xf32>
    %315 = vector.extract_strided_slice %297 {offsets = [0, 256], sizes = [16, 128], strides = [1, 1]} : vector<16x384xf32> to vector<16x128xf32>
    %c0_122 = arith.constant 0 : index
    %c0_123 = arith.constant 0 : index
    %316 = vector.load %arg8[%c0_122, %c0_123] : memref<1x128xf32, #tpu.memory_space<vmem>>, vector<1x128xf32>
    %317 = vector.broadcast %316 : vector<1x128xf32> to vector<16x128xf32>
    %318 = arith.addf %315, %317 : vector<16x128xf32>
    %319 = arith.mulf %305, %318 : vector<16x128xf32>
    %320 = arith.addf %314, %319 : vector<16x128xf32>
    %321 = math.tanh %320 : vector<16x128xf32>
    %cst_124 = arith.constant 1.000000e+00 : f32
    %322 = vector.broadcast %cst_124 : f32 to vector<16x128xf32>
    %323 = arith.subf %322, %313 : vector<16x128xf32>
    %324 = arith.mulf %323, %321 : vector<16x128xf32>
    %325 = arith.mulf %313, %280 : vector<16x128xf32>
    %326 = arith.addf %324, %325 : vector<16x128xf32>
    %327 = arith.truncf %326 : vector<16x128xf32> to vector<16x128xbf16>
    %c0_125 = arith.constant 0 : index
    %c0_126 = arith.constant 0 : index
    %328 = vector.load %arg9[%c0_125, %c0_126] : memref<128x256xbf16, #tpu.memory_space<vmem>>, vector<128x256xbf16>
    %cst_127 = arith.constant dense<0.000000e+00> : vector<16x256xf32>
    %329 = tpu.matmul %327, %328, %cst_127 {dimension_numbers = #tpu.dot_dimension_numbers<[1], [0], [0], [1], [0, 0, 1, 1], [], []>} : vector<16x128xbf16>, vector<128x256xbf16>, vector<16x256xf32> -> vector<16x256xf32>
    %c0_128 = arith.constant 0 : index
    %c0_129 = arith.constant 0 : index
    %330 = vector.load %arg10[%c0_128, %c0_129] : memref<1x256xf32, #tpu.memory_space<vmem>>, vector<1x256xf32>
    %331 = vector.broadcast %330 : vector<1x256xf32> to vector<16x256xf32>
    %332 = arith.addf %329, %331 : vector<16x256xf32>
    %c256_i32_130 = arith.constant 256 : i32
    %333 = arith.muli %c6_i32, %c256_i32_130 : i32
    %334 = tpu.assume_multiple %333, 128 : i32
    %c0_131 = arith.constant 0 : index
    %335 = arith.index_cast %334 : i32 to index
    %336 = vector.load %arg11[%c0_131, %335] : memref<16x1792xf32, #tpu.memory_space<vmem>>, vector<16x256xf32>
    tpu.vector_store %arg11[%c0_131, %335], %332 {strides = array<i32>} : memref<16x1792xf32, #tpu.memory_space<vmem>>, vector<16x256xf32>,
    %c7_i32 = arith.constant 7 : i32
    return
  }
  func.func @transform_0(%arg0: i32) -> (i32, i32) {
    %c0_i32 = arith.constant 0 : i32
    %c0_i32_0 = arith.constant 0 : i32
    %c0_i32_1 = arith.constant 0 : i32
    return %c0_i32, %c0_i32_0 : i32, i32
  }
  func.func @transform_1(%arg0: i32) -> (i32, i32) {
    %c0_i32 = arith.constant 0 : i32
    %c0_i32_0 = arith.constant 0 : i32
    %c0_i32_1 = arith.constant 0 : i32
    return %c0_i32, %c0_i32_0 : i32, i32
  }
  func.func @transform_2(%arg0: i32) -> (i32, i32) {
    %c0_i32 = arith.constant 0 : i32
    %c0_i32_0 = arith.constant 0 : i32
    %c0_i32_1 = arith.constant 0 : i32
    return %c0_i32, %c0_i32_0 : i32, i32
  }
  func.func @transform_3(%arg0: i32) -> (i32, i32) {
    %c0_i32 = arith.constant 0 : i32
    %c0_i32_0 = arith.constant 0 : i32
    %c0_i32_1 = arith.constant 0 : i32
    return %c0_i32, %c0_i32_0 : i32, i32
  }
  func.func @transform_4(%arg0: i32) -> (i32, i32) {
    %c0_i32 = arith.constant 0 : i32
    %c0_i32_0 = arith.constant 0 : i32
    %c0_i32_1 = arith.constant 0 : i32
    return %c0_i32, %c0_i32_0 : i32, i32
  }
  func.func @transform_5(%arg0: i32) -> (i32, i32) {
    %c0_i32 = arith.constant 0 : i32
    %c0_i32_0 = arith.constant 0 : i32
    %c0_i32_1 = arith.constant 0 : i32
    return %c0_i32, %c0_i32_0 : i32, i32
  }
  func.func @transform_6(%arg0: i32) -> (i32, i32) {
    %c0_i32 = arith.constant 0 : i32
    %c0_i32_0 = arith.constant 0 : i32
    %c0_i32_1 = arith.constant 0 : i32
    return %c0_i32, %c0_i32_0 : i32, i32
  }
  func.func @transform_7(%arg0: i32) -> (i32, i32) {
    %c0_i32 = arith.constant 0 : i32
    %c0_i32_0 = arith.constant 0 : i32
    %c0_i32_1 = arith.constant 0 : i32
    return %c0_i32, %c0_i32_0 : i32, i32
  }
  func.func @transform_8(%arg0: i32) -> (i32, i32) {
    %c0_i32 = arith.constant 0 : i32
    %c0_i32_0 = arith.constant 0 : i32
    %c0_i32_1 = arith.constant 0 : i32
    return %c0_i32, %c0_i32_0 : i32, i32
  }
  func.func @transform_9(%arg0: i32) -> (i32, i32) {
    %c0_i32 = arith.constant 0 : i32
    %c0_i32_0 = arith.constant 0 : i32
    %c0_i32_1 = arith.constant 0 : i32
    return %c0_i32, %c0_i32_0 : i32, i32
  }
  func.func @transform_10(%arg0: i32) -> (i32, i32) {
    %c0_i32 = arith.constant 0 : i32
    %c0_i32_0 = arith.constant 0 : i32
    %c0_i32_1 = arith.constant 0 : i32
    return %c0_i32, %c0_i32_0 : i32, i32
  }
}

</mosaic_0001>

<bundles_post_ra>
// kernel: tpu_custom_call.1
= control target key start
LH: loop header
LB: loop body
LE: loop exit
PB: predicated region body
PF: predicated region fallthrough
CT: control target
= control target key end

     0   :  { %15 = vsyncpa [#allocation4], 0  ;;  %s6024_s0 = inlined_call_operand.hbm [shape: bf16[112,128], index: 0, kind: input, shape index: {}]   ;;  %s6025_s1 = inlined_call_operand.hbm [shape: bf16[16,32], index: 1, kind: input, shape index: {}]   ;;  %s6026_s2 = inlined_call_operand.hbm [shape: bf16[32,128], index: 2, kind: input, shape index: {}]   ;;  %s6027_s3 = inlined_call_operand.vmem [shape: f32[1,128], index: 3, kind: input, shape index: {}]   ;;  %s6028_s4 = inlined_call_operand.hbm [shape: bf16[128,384], index: 4, kind: input, shape index: {}]   ;;  %s6029_s5 = inlined_call_operand.vmem [shape: f32[1,384], index: 5, kind: input, shape index: {}]   ;;  %s6030_s6 = inlined_call_operand.hbm [shape: bf16[128,384], index: 6, kind: input, shape index: {}]   ;;  %s6031_s7 = inlined_call_operand.vmem [shape: f32[1,128], index: 7, kind: input, shape index: {}]   ;;  %s6032_s8 = inlined_call_operand.hbm [shape: bf16[128,256], index: 8, kind: input, shape index: {}]   ;;  %s6033_s9 = inlined_call_operand.vmem [shape: f32[1,256], index: 9, kind: input, shape index: {}]   ;;  %s6034_s10 = inlined_call_operand.hbm [shape: f32[16,1792], index: 10, kind: output, shape index: {}]  }
   0x1   :  { %16 = vsyncpa [#allocation7], 0 }
   0x2   :  { %17 = vsyncpa [#allocation10], 0 }
   0x3   :  { %18 = vsyncpa [#allocation13], 0 }
   0x4   :  { %19 = vsyncpa [#allocation5], 0  ;;  %s5161_s13 = smov [#allocation6]   ;;  %s5162_s15 = smov [#allocation9]  }
   0x5   :  { %s37_s14 = sshll.u32 %s5161_s13, 4  ;;  %s63_s16 = sshll.u32 %s5162_s15, 4  ;;  %s38_s14 = int_to_ptr.vmem [resolvable:$true] %s37_s14  ;;  %s5234_s16 = int_to_ptr.vmem [resolvable:$true] %s63_s16 }
   0x6   :  { %s4997_s19 = scalar_lea.hbm %s6025_s1, 128 }
   0x7   :  { %p4998_p0 = scmp.ne.s32.totalorder %s6025_s1, %s4997_s19  ;;  %p5001_p1 = scmp.lt.u32.totalorder %s4997_s19, %s6025_s1 }
   0x9   :  { %p5003_p2 = pnand %p5001_p1, %p4998_p0 }
   0xb   :  { %5006 = shalt.err (!%p5003_p2)
}
   0xc   :  { %s5007_s24 = scalar_lea.vmem %s38_s14, 128  ;;  %p5012_p4 = scmp.lt.s32.totalorder %s38_s14, %s38_s14 }
   0xd   :  { %p5008_p3 = scmp.ne.s32.totalorder %s38_s14, %s5007_s24  ;;  %p5013_p5 = scmp.lt.s32.totalorder %s5007_s24, %s5007_s24 }
   0xf   :  { %p5014_p6 = por %p5013_p5, %p5012_p4 }
  0x11   :  { %p5015_p7 = pnand %p5014_p6, %p5008_p3 }
  0x13   :  { %5018 = shalt.err (!%p5015_p7)
}
  0x14   :  { %s5163_s25 = smov 64   ;;  %s5164_s26 = smov 4  }
  0x15   :  { %43 = dma.hbm_to_vmem [thread:$0]  %s6025_s1, 128, %s38_s14, [#allocation7], %s5163_s25, %s5163_s25, %s5164_s26  }
  0x16   :  { %s5019_s11 = scalar_lea.hbm %s6028_s4, 3072 }
  0x17   :  { %p5020_p8 = scmp.ne.s32.totalorder %s6028_s4, %s5019_s11  ;;  %p5023_p9 = scmp.lt.u32.totalorder %s5019_s11, %s6028_s4 }
  0x19   :  { %p5025_p10 = pnand %p5023_p9, %p5020_p8 }
  0x1b   :  { %5028 = shalt.err (!%p5025_p10)
}
  0x1c   :  { %s5029_s18 = scalar_lea.vmem %s5234_s16, 3072  ;;  %p5034_p12 = scmp.lt.s32.totalorder %s5234_s16, %s5234_s16 }
  0x1d   :  { %p5030_p11 = scmp.ne.s32.totalorder %s5234_s16, %s5029_s18  ;;  %p5035_p13 = scmp.lt.s32.totalorder %s5029_s18, %s5029_s18 }
  0x1f   :  { %p5036_p0 = por %p5035_p13, %p5034_p12 }
  0x21   :  { %p5037_p1 = pnand %p5036_p0, %p5030_p11 }
  0x23   :  { %5040 = shalt.err (!%p5037_p1)
}
  0x24   :  { %s5165_s1 = smov 192   ;;  %s5166_s14 = smov 12  }
  0x25   :  { %69 = dma.hbm_to_vmem [thread:$0]  %s6028_s4, 3072, %s5234_s16, [#allocation10], %s5165_s1, %s5165_s1, %s5166_s14  }
  0x26   :  { %s5167_s21 = smov [#allocation3]   ;;  %s5168_s23 = smov [#allocation8]  }
  0x27   :  { %s25_s22 = sshll.u32 %s5167_s21, 4  ;;  %s49_s24 = sshll.u32 %s5168_s23, 4  ;;  %s26_s22 = int_to_ptr.vmem [resolvable:$true] %s25_s22  ;;  %s5271_s24 = int_to_ptr.vmem [resolvable:$true] %s49_s24 }
  0x28   :  { %s5041_s29 = scalar_lea.hbm %s6024_s0, 896 }
  0x29   :  { %p5042_p2 = scmp.ne.s32.totalorder %s6024_s0, %s5041_s29  ;;  %p5045_p3 = scmp.lt.u32.totalorder %s5041_s29, %s6024_s0 }
  0x2b   :  { %p5047_p4 = pnand %p5045_p3, %p5042_p2 }
  0x2d   :  { %5050 = shalt.err (!%p5047_p4)
}
  0x2e   :  { %s5051_s4 = scalar_lea.vmem %s26_s22, 896  ;;  %p5056_p6 = scmp.lt.s32.totalorder %s26_s22, %s26_s22 }
  0x2f   :  { %p5052_p5 = scmp.ne.s32.totalorder %s26_s22, %s5051_s4  ;;  %p5057_p7 = scmp.lt.s32.totalorder %s5051_s4, %s5051_s4 }
  0x31   :  { %p5058_p8 = por %p5057_p7, %p5056_p6 }
  0x33   :  { %p5059_p9 = pnand %p5058_p8, %p5052_p5 }
  0x35   :  { %5062 = shalt.err (!%p5059_p9)
}
  0x36   :  { %31 = dma.hbm_to_vmem [thread:$0]  %s6024_s0, 896, %s26_s22, [#allocation4], %s5163_s25, %s5163_s25, %s5164_s26  }
  0x37   :  { %s5063_s19 = scalar_lea.hbm %s6026_s2, 256 }
  0x38   :  { %p5064_p10 = scmp.ne.s32.totalorder %s6026_s2, %s5063_s19  ;;  %p5067_p11 = scmp.lt.u32.totalorder %s5063_s19, %s6026_s2 }
  0x3a   :  { %p5069_p12 = pnand %p5067_p11, %p5064_p10 }
  0x3c   :  { %5072 = shalt.err (!%p5069_p12)
}
  0x3d   :  { %s5073_s28 = scalar_lea.vmem %s5271_s24, 256  ;;  %p5078_p0 = scmp.lt.s32.totalorder %s5271_s24, %s5271_s24 }
  0x3e   :  { %p5074_p13 = scmp.ne.s32.totalorder %s5271_s24, %s5073_s28  ;;  %p5079_p1 = scmp.lt.s32.totalorder %s5073_s28, %s5073_s28 }
  0x40   :  { %p5080_p2 = por %p5079_p1, %p5078_p0 }
  0x42   :  { %p5081_p3 = pnand %p5080_p2, %p5074_p13 }
  0x44   :  { %5084 = shalt.err (!%p5081_p3)
}
  0x45   :  { %55 = dma.hbm_to_vmem [thread:$0]  %s6026_s2, 256, %s5271_s24, [#allocation7], %s5163_s25, %s5163_s25, %s5164_s26  }
  0x46   :  { %s5169_s29 = smov [#allocation11]   ;;  %s5170_s11 = smov [#allocation12]  }
  0x47   :  { %s77_s30 = sshll.u32 %s5169_s29, 4  ;;  %s91_s12 = sshll.u32 %s5170_s11, 4  ;;  %s78_s30 = int_to_ptr.vmem [resolvable:$true] %s77_s30  ;;  %s5308_s12 = int_to_ptr.vmem [resolvable:$true] %s91_s12 }
  0x48   :  { %s5085_s16 = scalar_lea.hbm %s6030_s6, 3072 }
  0x49   :  { %p5086_p4 = scmp.ne.s32.totalorder %s6030_s6, %s5085_s16  ;;  %p5089_p5 = scmp.lt.u32.totalorder %s5085_s16, %s6030_s6 }
  0x4b   :  { %p5091_p6 = pnand %p5089_p5, %p5086_p4 }
  0x4d   :  { %5094 = shalt.err (!%p5091_p6)
}
  0x4e   :  { %s5095_s2 = scalar_lea.vmem %s78_s30, 3072  ;;  %p5100_p8 = scmp.lt.s32.totalorder %s78_s30, %s78_s30 }
  0x4f   :  { %p5096_p7 = scmp.ne.s32.totalorder %s78_s30, %s5095_s2  ;;  %p5101_p9 = scmp.lt.s32.totalorder %s5095_s2, %s5095_s2 }
  0x51   :  { %p5102_p10 = por %p5101_p9, %p5100_p8 }
  0x53   :  { %p5103_p11 = pnand %p5102_p10, %p5096_p7 }
  0x55   :  { %5106 = shalt.err (!%p5103_p11)
}
  0x56   :  { %83 = dma.hbm_to_vmem [thread:$0]  %s6030_s6, 3072, %s78_s30, [#allocation10], %s5165_s1, %s5165_s1, %s5166_s14  }
  0x57   :  { %s5107_s21 = scalar_lea.hbm %s6032_s8, 2048 }
  0x58   :  { %p5108_p12 = scmp.ne.s32.totalorder %s6032_s8, %s5107_s21  ;;  %p5111_p13 = scmp.lt.u32.totalorder %s5107_s21, %s6032_s8 }
  0x5a   :  { %p5113_p0 = pnand %p5111_p13, %p5108_p12 }
  0x5c   :  { %5116 = shalt.err (!%p5113_p0)
}
  0x5d   :  { %s5117_s22 = scalar_lea.vmem %s5308_s12, 2048  ;;  %p5122_p2 = scmp.lt.s32.totalorder %s5308_s12, %s5308_s12 }
  0x5e   :  { %p5118_p1 = scmp.ne.s32.totalorder %s5308_s12, %s5117_s22  ;;  %p5123_p3 = scmp.lt.s32.totalorder %s5117_s22, %s5117_s22 }
  0x60   :  { %p5124_p4 = por %p5123_p3, %p5122_p2 }
  0x62   :  { %p5125_p5 = pnand %p5124_p4, %p5118_p1 }
  0x64   :  { %5128 = shalt.err (!%p5125_p5)
}
  0x65   :  { %s5171_s6 = smov 128   ;;  %s5172_s1 = smov 8  }
  0x66   :  { %97 = dma.hbm_to_vmem [thread:$0]  %s6032_s8, 2048, %s5308_s12, [#allocation13], %s5171_s6, %s5171_s6, %s5172_s1  }
  0x67   :  { %5151 = dma.done.wait [#allocation4], 896  }
  0x68   :  { %5152 = vsyncadd [#allocation4], 4294966400 }
  0x69   :  { %5153 = dma.done.wait [#allocation7], 384  }
  0x6a   :  { %5154 = vsyncadd [#allocation7], 4294966912 }
  0x6b   :  { %5155 = dma.done.wait [#allocation10], 6144  }
  0x6c   :  { %5156 = vsyncadd [#allocation10], 4294961152 }
  0x6d   :  { %5157 = dma.done.wait [#allocation13], 2048  }
  0x6e   :  { %5158 = vsyncadd [#allocation13], 4294965248  ;;  %v6035_v0 = vmov 0.0   ;;  %vm5174_vm0 = vmmov 0   ;;  %v6037_v1 = vmov 0   ;;  %v4614_v2 = vld [vmem:[#allocation8] sm:$0xff]  }
  0x6f   :  { %4348 = vmatprep.subr.bf16.mxu0 %v6035_v0  ;;  %4352 = vmatprep.mubr.msk.bf16.mxu0 %vm5174_vm0, %v6035_v0  ;;  %v4615_v3 = vld [vmem:[#allocation8 + $0x8] sm:$0xff]   ;;  %v4616_v4 = vld [vmem:[#allocation6] sm:$0xff]   ;;  %v4617_v5 = vld [vmem:[#allocation9 + $0x4] ss:$12 sps:$4 sm:$0xff]   ;;  %vm149_vm1 = vcmask 261120   ;;  %s5176_s22 = smov [#allocation14]  }
  0x70   :  { %461 = vmatprep.mubr.bf16.mxu1 %v6037_v1  ;;  %4349 = vmatpush3.bf16.msra.mxu0 %v4614_v2  ;;  %v4619_v6 = vld [vmem:[#allocation9] ss:$12 sps:$4 sm:$0xff]   ;;  %v4620_v7 = vld [vmem:[#allocation9 + $0x8] ss:$12 sps:$4 sm:$0xff]   ;;  %v4623_v9 = vld [vmem:[#allocation9 + $0x18] ss:$12 sps:$4 sm:$0xff]  }
  0x71   :  { %4350 = vmatprep.subr.bf16.mxu0 %v6035_v0  ;;  %429 = vmatprep.subr.bf16.mxu1 %v4617_v5  ;;  %v4621_v8 = vld [vmem:[#allocation9 + $0x1c] ss:$12 sps:$4 sm:$0xff]   ;;  %v4625_v10 = vld [vmem:[#allocation9 + $0x34] ss:$12 sps:$4 sm:$0xff]   ;;  %v4629_v13 = vld [vmem:[#allocation9 + $0x4c] ss:$12 sps:$4 sm:$0xff]  }
  0x72   :  { %430 = vmatpush1.bf16.msra.mxu1 %v4619_v6  ;;  %v4624_v11 = vld [vmem:[#allocation9 + $0x20] ss:$12 sps:$4 sm:$0xff]   ;;  %v4627_v12 = vld [vmem:[#allocation9 + $0x30] ss:$12 sps:$4 sm:$0xff]   ;;  %v4628_v14 = vld [vmem:[#allocation9 + $0x38] ss:$12 sps:$4 sm:$0xff]  }
  0x73   :  { %431 = vmatprep.subr.bf16.mxu1 %v4621_v8  ;;  %v4631_v15 = vld [vmem:[#allocation9 + $0x48] ss:$12 sps:$4 sm:$0xff]   ;;  %v4633_v16 = vld [vmem:[#allocation9 + $0x64] ss:$12 sps:$4 sm:$0xff]   ;;  %v4635_v18 = vld [vmem:[#allocation9 + $0x60] ss:$12 sps:$4 sm:$0xff]   ;;  %v244_v8 = vlaneseq }
  0x74   :  { %4351 = vmatpush3.bf16.msra.mxu0 %v4615_v3  ;;  %v4632_v17 = vld [vmem:[#allocation9 + $0x50] ss:$12 sps:$4 sm:$0xff]   ;;  %v4636_v20 = vld [vmem:[#allocation9 + $0x68] ss:$12 sps:$4 sm:$0xff]   ;;  %v4639_v21 = vld [vmem:[#allocation9 + $0x78] ss:$12 sps:$4 sm:$0xff]  }
  0x75   :  { %4356 = vmatprep.subr.bf16.mxu0 %v6035_v0  ;;  %v4637_v19 = vld [vmem:[#allocation9 + $0x7c] ss:$12 sps:$4 sm:$0xff]   ;;  %v4641_v22 = vld [vmem:[#allocation9 + $0x94] ss:$12 sps:$4 sm:$0xff]   ;;  %v4645_v25 = vld [vmem:[#allocation9 + $0xac] ss:$12 sps:$4 sm:$0xff]  }
  0x76   :  { %432 = vmatpush1.bf16.msra.mxu1 %v4623_v9  ;;  %v4640_v23 = vld [vmem:[#allocation9 + $0x80] ss:$12 sps:$4 sm:$0xff]   ;;  %v4643_v24 = vld [vmem:[#allocation9 + $0x90] ss:$12 sps:$4 sm:$0xff]   ;;  %v4644_v26 = vld [vmem:[#allocation9 + $0x98] ss:$12 sps:$4 sm:$0xff]  }
  0x77   :  { %4353 = vmatmul.mubr.msk.bf16.vlgmr.msra.gmra.mrb[0].mxu0 %vm149_vm1, %v4616_v4  ;;  %433 = vmatprep.subr.bf16.mxu1 %v4625_v10  ;;  %v4647_v27 = vld [vmem:[#allocation9 + $0xa8] ss:$12 sps:$4 sm:$0xff]   ;;  %v5356_v28 = vld [vmem:[#allocation11 + $0x4] ss:$12 sps:$4 sm:$0xff]   ;;  %v5358_v31 = vld [vmem:[#allocation11] ss:$12 sps:$4 sm:$0xff]  }
  0x78   :  { %4357 = vmatpush3.bf16.msra.mxu0 %v4620_v7  ;;  %4372 = vmatprep.mubr.msk.bf16.mxu0 %vm5174_vm0, %v6035_v0  ;;  %v4648_v29 = vld [vmem:[#allocation9 + $0xb0] ss:$12 sps:$4 sm:$0xff]   ;;  %v5364_v33 = vld [vmem:[#allocation11 + $0x18] ss:$12 sps:$4 sm:$0xff]   ;;  %v5367_v34 = vld [vmem:[#allocation11 + $0x34] ss:$12 sps:$4 sm:$0xff]  }
  0x79   :  { %4358 = vmatprep.subr.bf16.mxu0 %v6035_v0  ;;  %v4652_v30 = vld [vmem:[#allocation3] sm:$0xff]   ;;  %v5362_v32 = vld [vmem:[#allocation11 + $0x1c] ss:$12 sps:$4 sm:$0xff]   ;;  %v5377_v38 = vld [vmem:[#allocation11 + $0x4c] ss:$12 sps:$4 sm:$0xff]   ;;  %v5451_v9 = vshrl.u32 %v244_v8, 7 }
  0x7a   :  { %434 = vmatpush1.bf16.msra.mxu1 %v4627_v12  ;;  %v4665_v35 = vld [vmem:[#allocation11 + $0x8] ss:$12 sps:$4 sm:$0xff]   ;;  %v4656_v36 = vld [vmem:[#allocation3 + $0x8] sm:$0xff]   ;;  %v4669_v39 = vld [vmem:[#allocation11 + $0x20] ss:$12 sps:$4 sm:$0xff]   ;;  %s3895_s6 = sshll.u32 %s5176_s22, 4  ;;  %s3896_s6 = int_to_ptr.vmem [resolvable:$true] %s3895_s6 }
  0x7b   :  { %435 = vmatprep.subr.bf16.mxu1 %v4629_v13  ;;  %v5372_v37 = vld [vmem:[#allocation11 + $0x30] ss:$12 sps:$4 sm:$0xff]   ;;  %v5380_v40 = vld [vmem:[#allocation11 + $0x48] ss:$12 sps:$4 sm:$0xff]   ;;  %v4671_v42 = vld [vmem:[#allocation11 + $0x38] ss:$12 sps:$4 sm:$0xff]   ;;  %p5134_p7 = scmp.lt.s32.totalorder %s3896_s6, %s3896_s6 }
  0x7c   :  { %4359 = vmatpush3.bf16.msra.mxu0 %v4624_v11  ;;  %v5383_v41 = vld [vmem:[#allocation11 + $0x64] ss:$12 sps:$4 sm:$0xff]   ;;  %v5388_v44 = vld [vmem:[#allocation11 + $0x60] ss:$12 sps:$4 sm:$0xff]   ;;  %v5391_v45 = vld [vmem:[#allocation11 + $0x7c] ss:$12 sps:$4 sm:$0xff]  }
  0x7d   :  { %4360 = vmatprep.subr.bf16.mxu0 %v6035_v0  ;;  %v4660_v43 = vld [vmem:[#allocation3 + $0x10] sm:$0xff]   ;;  %v4675_v46 = vld [vmem:[#allocation11 + $0x50] ss:$12 sps:$4 sm:$0xff]   ;;  %v4680_v49 = vld [vmem:[#allocation11 + $0x68] ss:$12 sps:$4 sm:$0xff]   ;;  %v254_v13 = vsub.s32 2, %v5451_v9 }
  0x7e   :  { %436 = vmatpush1.bf16.msra.mxu1 %v4631_v15  ;;  %v5397_v47 = vld [vmem:[#allocation11 + $0x78] ss:$12 sps:$4 sm:$0xff]   ;;  %v5400_v48 = vld [vmem:[#allocation11 + $0x94] ss:$12 sps:$4 sm:$0xff]   ;;  %v4664_v50 = vld [vmem:[#allocation3 + $0x18] sm:$0xff]  }
  0x7f   :  { %437 = vmatprep.subr.bf16.mxu1 %v4633_v16  ;;  %v5406_v51 = vld [vmem:[#allocation11 + $0x90] ss:$12 sps:$4 sm:$0xff]   ;;  %v4681_v52 = vld [vmem:[#allocation11 + $0x80] ss:$12 sps:$4 sm:$0xff]   ;;  %v4686_v56 = vld [vmem:[#allocation11 + $0x98] ss:$12 sps:$4 sm:$0xff]  }
  0x80   :  { %4361 = vmatpush3.bf16.msra.mxu0 %v4628_v14  ;;  %v4670_v53 = vld [vmem:[#allocation3 + $0x20] sm:$0xff]   ;;  %v4676_v54 = vld [vmem:[#allocation3 + $0x28] sm:$0xff]   ;;  %v4682_v55 = vld [vmem:[#allocation3 + $0x30] sm:$0xff]  }
  0x81   :  { %4362 = vmatprep.subr.bf16.mxu0 %v6035_v0  ;;  %v5425_v57 = vld [vmem:[#allocation11 + $0xa8] ss:$12 sps:$4 sm:$0xff]   ;;  %v5427_v58 = vld [vmem:[#allocation11 + $0xac] ss:$12 sps:$4 sm:$0xff]   ;;  %v4687_v59 = vld [vmem:[#allocation11 + $0xb0] ss:$12 sps:$4 sm:$0xff]  }
  0x82   :  { %438 = vmatpush1.bf16.msra.mxu1 %v4635_v18  ;;  %v3916_v60 = vld [vmem:[%s6027_s3] ss:$0 sm:$0xff] }
  0x83   :  { %439 = vmatprep.subr.bf16.mxu1 %v4637_v19  ;;  %v5461_v15 = vld [vmem:[%s6029_s5] sm:$0x7] }
  0x84   :  { %4363 = vmatpush3.bf16.msra.mxu0 %v4632_v17  ;;  %v5464_v16 = vrot.slane %v5461_v15, %v254_v13 }
  0x85   :  { %4364 = vmatprep.subr.bf16.mxu0 %v6035_v0 }
  0x86   :  { %440 = vmatpush1.bf16.msra.mxu1 %v4639_v21 }
  0x87   :  { %441 = vmatprep.subr.bf16.mxu1 %v4641_v22 }
  0x88   :  { %4365 = vmatpush3.bf16.msra.mxu0 %v4636_v20 }
  0x89   :  { %4366 = vmatprep.subr.bf16.mxu0 %v6035_v0 }
  0x8a   :  { %442 = vmatpush1.bf16.msra.mxu1 %v4643_v24 }
  0x8b   :  { %443 = vmatprep.subr.bf16.mxu1 %v4645_v25 }
  0x8c   :  { %4367 = vmatpush3.bf16.msra.mxu0 %v4640_v23 }
  0x8d   :  { %4368 = vmatprep.subr.bf16.mxu0 %v6035_v0 }
  0x8e   :  { %444 = vmatpush1.bf16.msra.mxu1 %v4647_v27 }
  0x8f   :  { %833 = vmatprep.subr.bf16.mxu1 %v5356_v28 }
  0x90   :  { %4369 = vmatpush3.bf16.msra.mxu0 %v4644_v26 }
  0x91   :  { %4370 = vmatprep.subr.bf16.mxu0 %v6035_v0  ;;  %462 = vmatmul.mubr.bf16.vlgmr.msra.gmra.mrb[0].mxu1 %v4652_v30 }
  0x92   :  { %834 = vmatpush1.bf16.msra.mxu1 %v5358_v31  ;;  %471 = vmatprep.mubr.bf16.mxu1 %v6037_v1 }
  0x93   :  { %835 = vmatprep.subr.bf16.mxu1 %v5362_v32 }
  0x94   :  { %4371 = vmatpush3.bf16.msra.mxu0 %v4648_v29 }
  0x95   :  { %4400 = vmatprep.subr.bf16.mxu0 %v6035_v0 }
  0x96   :  { %836 = vmatpush1.bf16.msra.mxu1 %v5364_v33 }
  0x97   :  { %4373 = vmatmul.mubr.bf16.vlgmr.msra.gmra.mrb[4].mxu0 %v4652_v30  ;;  %837 = vmatprep.subr.bf16.mxu1 %v5367_v34 }
  0x98   :  { %4376 = vmatprep.mubr.msk.bf16.mxu0 %vm5174_vm0, %v6035_v0  ;;  %4401 = vmatpush3.bf16.msra.mxu0 %v4665_v35 }
  0x99   :  { %4402 = vmatprep.subr.bf16.mxu0 %v6035_v0  ;;  %472 = vmatmul.mubr.bf16.gmra.mrb[4].mxu1 %v4656_v36 }
  0x9a   :  { %838 = vmatpush1.bf16.msra.mxu1 %v5372_v37  ;;  %481 = vmatprep.mubr.bf16.mxu1 %v6037_v1 }
  0x9b   :  { %839 = vmatprep.subr.bf16.mxu1 %v5377_v38 }
  0x9c   :  { %4403 = vmatpush3.bf16.msra.mxu0 %v4669_v39 }
  0x9d   :  { %4404 = vmatprep.subr.bf16.mxu0 %v6035_v0 }
  0x9e   :  { %840 = vmatpush1.bf16.msra.mxu1 %v5380_v40 }
  0x9f   :  { %4377 = vmatmul.mubr.bf16.gmra.mrb[8].mxu0 %v4656_v36  ;;  %841 = vmatprep.subr.bf16.mxu1 %v5383_v41 }
  0xa0   :  { %4380 = vmatprep.mubr.msk.bf16.mxu0 %vm5174_vm0, %v6035_v0  ;;  %4405 = vmatpush3.bf16.msra.mxu0 %v4671_v42 }
  0xa1   :  { %4406 = vmatprep.subr.bf16.mxu0 %v6035_v0  ;;  %482 = vmatmul.mubr.bf16.gmra.mrb[8].mxu1 %v4660_v43 }
  0xa2   :  { %491 = vmatprep.mubr.bf16.mxu1 %v6037_v1  ;;  %842 = vmatpush1.bf16.msra.mxu1 %v5388_v44 }
  0xa3   :  { %843 = vmatprep.subr.bf16.mxu1 %v5391_v45 }
  0xa4   :  { %4407 = vmatpush3.bf16.msra.mxu0 %v4675_v46 }
  0xa5   :  { %4408 = vmatprep.subr.bf16.mxu0 %v6035_v0 }
  0xa6   :  { %844 = vmatpush1.bf16.msra.mxu1 %v5397_v47 }
  0xa7   :  { %4381 = vmatmul.mubr.bf16.gmra.mrb[12].mxu0 %v4660_v43  ;;  %845 = vmatprep.subr.bf16.mxu1 %v5400_v48 }
  0xa8   :  { %4384 = vmatprep.mubr.msk.bf16.mxu0 %vm5174_vm0, %v6035_v0  ;;  %4409 = vmatpush3.bf16.msra.mxu0 %v4680_v49 }
  0xa9   :  { %4410 = vmatprep.subr.bf16.mxu0 %v6035_v0  ;;  %492 = vmatmul.mubr.bf16.gmra.mrb[12].mxu1 %v4664_v50 }
  0xaa   :  { %501 = vmatprep.mubr.bf16.mxu1 %v6037_v1  ;;  %846 = vmatpush1.bf16.msra.mxu1 %v5406_v51 }
  0xab   :  { %847 = vmatprep.subr.bf16.mxu1 %v5427_v58 }
  0xac   :  { %4411 = vmatpush3.bf16.msra.mxu0 %v4681_v52 }
  0xad   :  { %4412 = vmatprep.subr.bf16.mxu0 %v6035_v0 }
  0xae   :  { %848 = vmatpush1.bf16.msra.mxu1 %v5425_v57 }
  0xaf   :  { %4385 = vmatmul.mubr.bf16.gmra.mrb[16].mxu0 %v4664_v50 }
  0xb0   :  { %4388 = vmatprep.mubr.msk.bf16.mxu0 %vm5174_vm0, %v6035_v0  ;;  %4413 = vmatpush3.bf16.msra.mxu0 %v4686_v56 }
  0xb1   :  { %502 = vmatmul.mubr.bf16.gmra.mrb[16].mxu1 %v4670_v53  ;;  %4414 = vmatprep.subr.bf16.mxu0 %v6035_v0 }
  0xb2   :  { %511 = vmatprep.mubr.bf16.mxu1 %v6037_v1 }
  0xb4   :  { %4415 = vmatpush3.bf16.msra.mxu0 %v4687_v59 }
  0xb5   :  { %4420 = vmatprep.subr.bf16.mxu0 %v6035_v0 }
  0xb7   :  { %4389 = vmatmul.mubr.bf16.gmra.mrb[20].mxu0 %v4670_v53 }
  0xb8   :  { %4392 = vmatprep.mubr.msk.bf16.mxu0 %vm5174_vm0, %v6035_v0 }
  0xb9   :  { %512 = vmatmul.mubr.bf16.gmra.mrb[20].mxu1 %v4676_v54 }
  0xba   :  { %521 = vmatprep.mubr.bf16.mxu1 %v6037_v1 }
  0xbf   :  { %4393 = vmatmul.mubr.bf16.gmra.mrb[24].mxu0 %v4676_v54 }
  0xc0   :  { %4396 = vmatprep.mubr.msk.bf16.mxu0 %vm5174_vm0, %v6035_v0 }
  0xc1   :  { %522 = vmatmul.mubr.bf16.gmra.mrb[24].mxu1 %v4682_v55 }
  0xc2   :  { %865 = vmatprep.mubr.bf16.mxu1 %v6037_v1 }
  0xc7   :  { %4397 = vmatmul.mubr.bf16.gmra.mrb[28].mxu0 %v4682_v55 }
  0xc8   :  { %4416 = vmatprep.mubr.msk.bf16.mxu0 %vm5174_vm0, %v6035_v0 }
 0x14a   :  { %v187_v61 = vpop.f32.mrb[0].mxu0 }
 0x14b   :  { %v5438_v62 = vadd.f32 %v3916_v60, %v187_v61  ;;  %v4354_v63 = vpop.f32.mrb[1].mxu0 }
 0x14c   :  { %v190_v2 = vpop.f32.mrb[2].mxu0 }
 0x14d   :  { %v5440_v3 = vadd.f32 %v3916_v60, %v190_v2  ;;  %v4355_v4 = vpop.f32.mrb[3].mxu0  ;;  %v6040_v5 = vmax.f32 %v5438_v62, 0.0 }
 0x14f   :  { %v6039_v6 = vmax.f32 %v5440_v3, 0.0 }
 0x151   :  { %v672_v7 = vpack.c.bf16 %v6039_v6, %v6040_v5 }
 0x153   :  { %866 = vmatmul.mubr.bf16.vlgmr.msra.gmra.mrb[0].mxu1 %v672_v7  ;;  %4417 = vmatmul.mubr.bf16.vlgmr.msra.gmra.mrb[32].mxu0 %v672_v7 }
 0x154   :  { %1109 = vmatprep.mubr.bf16.mxu1 %v6037_v1  ;;  %4436 = vmatprep.mubr.msk.bf16.mxu0 %vm5174_vm0, %v6035_v0 }
 0x16a   :  { %v5453_v10 = vpop.f32.mrb[4].mxu0 }
 0x16b   :  { %v4374_v11 = vpop.f32.mrb[5].mxu0 }
 0x16c   :  { %v5455_v12 = vpop.f32.mrb[6].mxu0 }
 0x16d   :  { %v4375_v14 = vpop.f32.mrb[7].mxu0 }
 0x16e   :  { %v5502_v14 = vld [vmem:[#allocation12 + $0x4] ss:$8 sps:$4 sm:$0xff]  }
 0x16f   :  { %1077 = vmatprep.subr.bf16.mxu1 %v5502_v14 }
 0x172   :  { %v574_v17 = vpop.f32.mrb[8].mxu0 }
 0x173   :  { %v5467_v18 = vadd.f32 %v574_v17, %v5464_v16  ;;  %v4378_v19 = vpop.f32.mrb[9].mxu0  ;;  %v5504_v17 = vld [vmem:[#allocation12] ss:$8 sps:$4 sm:$0xff]  }
 0x174   :  { %v577_v20 = vpop.f32.mrb[10].mxu0  ;;  %v4691_v19 = vld [vmem:[#allocation11 + $0x8] ss:$12 sps:$4 sm:$0xff]   ;;  %1078 = vmatpush1.bf16.msra.mxu1 %v5504_v17 }
 0x175   :  { %v5470_v21 = vadd.f32 %v577_v20, %v5464_v16  ;;  %v4379_v22 = vpop.f32.mrb[11].mxu0  ;;  %4421 = vmatpush3.bf16.msra.mxu0 %v4691_v19  ;;  %v5508_v20 = vld [vmem:[#allocation12 + $0x14] ss:$8 sps:$4 sm:$0xff]   ;;  %v5563_v19 = vsub.s32 1, %v5451_v9 }
 0x176   :  { %v5510_v22 = vld [vmem:[#allocation12 + $0x10] ss:$8 sps:$4 sm:$0xff]   ;;  %4422 = vmatprep.subr.bf16.mxu0 %v6035_v0  ;;  %1079 = vmatprep.subr.bf16.mxu1 %v5508_v20 }
 0x178   :  { %1080 = vmatpush1.bf16.msra.mxu1 %v5510_v22 }
 0x17a   :  { %v582_v23 = vpop.f32.mrb[12].mxu0 }
 0x17b   :  { %v5473_v24 = vadd.f32 %v582_v23, %v5464_v16  ;;  %v4382_v25 = vpop.f32.mrb[13].mxu0  ;;  %v4695_v23 = vld [vmem:[#allocation11 + $0x20] ss:$12 sps:$4 sm:$0xff]  }
 0x17c   :  { %v585_v26 = vpop.f32.mrb[14].mxu0  ;;  %4423 = vmatpush3.bf16.msra.mxu0 %v4695_v23  ;;  %v5515_v25 = vld [vmem:[#allocation12 + $0x24] ss:$8 sps:$4 sm:$0xff]  }
 0x17d   :  { %v5476_v27 = vadd.f32 %v585_v26, %v5464_v16  ;;  %v4383_v29 = vpop.f32.mrb[15].mxu0  ;;  %v5517_v26 = vld [vmem:[#allocation12 + $0x20] ss:$8 sps:$4 sm:$0xff]   ;;  %4424 = vmatprep.subr.bf16.mxu0 %v6035_v0  ;;  %1081 = vmatprep.subr.bf16.mxu1 %v5515_v25 }
 0x17e   :  { %v4699_v29 = vld [vmem:[#allocation11 + $0x38] ss:$12 sps:$4 sm:$0xff]   ;;  %1082 = vmatpush1.bf16.msra.mxu1 %v5517_v26 }
 0x180   :  { %4425 = vmatpush3.bf16.msra.mxu0 %v4699_v29 }
 0x181   :  { %4426 = vmatprep.subr.bf16.mxu0 %v6035_v0 }
 0x182   :  { %v590_v30 = vpop.f32.mrb[16].mxu0 }
 0x183   :  { %v5479_v35 = vadd.f32 %v590_v30, %v5464_v16  ;;  %v4386_v36 = vpop.f32.mrb[17].mxu0  ;;  %v5522_v30 = vld [vmem:[#allocation12 + $0x34] ss:$8 sps:$4 sm:$0xff]  }
 0x184   :  { %v593_v39 = vpop.f32.mrb[18].mxu0  ;;  %v5524_v36 = vld [vmem:[#allocation12 + $0x30] ss:$8 sps:$4 sm:$0xff]   ;;  %1083 = vmatprep.subr.bf16.mxu1 %v5522_v30 }
 0x185   :  { %6041 = vst [vmem:[#allocation20_spill] sm:$0xff] %v5479_v35  ;;  %v5482_v42 = vadd.f32 %v593_v39, %v5464_v16  ;;  %v4387_v43 = vpop.f32.mrb[19].mxu0  ;;  %v4703_v39 = vld [vmem:[#allocation11 + $0x50] ss:$12 sps:$4 sm:$0xff]   ;;  %1084 = vmatpush1.bf16.msra.mxu1 %v5524_v36  ;;  %v6050_v35 = vmax.f32 %v5440_v3, 0.0  ;;  %v6052_v3 = vmov 0.0  }
 0x186   :  { %4427 = vmatpush3.bf16.msra.mxu0 %v4703_v39  ;;  %v5529_v43 = vld [vmem:[#allocation12 + $0x44] ss:$8 sps:$4 sm:$0xff]  }
 0x187   :  { %6042 = vst [vmem:[#allocation21_spill] sm:$0xff] %v5482_v42  ;;  %4428 = vmatprep.subr.bf16.mxu0 %v6035_v0  ;;  %1085 = vmatprep.subr.bf16.mxu1 %v5529_v43 }
 0x18a   :  { %v598_v46 = vpop.f32.mrb[20].mxu0 }
 0x18b   :  { %v5485_v49 = vadd.f32 %v598_v46, %v5464_v16  ;;  %v4390_v50 = vpop.f32.mrb[21].mxu0  ;;  %v5531_v46 = vld [vmem:[#allocation12 + $0x40] ss:$8 sps:$4 sm:$0xff]  }
 0x18c   :  { %v601_v52 = vpop.f32.mrb[22].mxu0  ;;  %v4707_v50 = vld [vmem:[#allocation11 + $0x68] ss:$12 sps:$4 sm:$0xff]   ;;  %1086 = vmatpush1.bf16.msra.mxu1 %v5531_v46 }
 0x18d   :  { %6043 = vst [vmem:[#allocation22_spill] sm:$0xff] %v5485_v49  ;;  %v5488_v53 = vadd.f32 %v601_v52, %v5464_v16  ;;  %v4391_v54 = vpop.f32.mrb[23].mxu0  ;;  %v5535_v52 = vld [vmem:[#allocation12 + $0x54] ss:$8 sps:$4 sm:$0xff]   ;;  %4429 = vmatpush3.bf16.msra.mxu0 %v4707_v50  ;;  %v5571_v50 = vrot.slane %v5461_v15, %v5563_v19 }
 0x18e   :  { %v5538_v54 = vld [vmem:[#allocation12 + $0x50] ss:$8 sps:$4 sm:$0xff]   ;;  %1087 = vmatprep.subr.bf16.mxu1 %v5535_v52  ;;  %4430 = vmatprep.subr.bf16.mxu0 %v6035_v0 }
 0x18f   :  { %6044 = vst [vmem:[#allocation23_spill] sm:$0xff] %v5488_v53 }
 0x190   :  { %1088 = vmatpush1.bf16.msra.mxu1 %v5538_v54 }
 0x192   :  { %v606_v55 = vpop.f32.mrb[24].mxu0 }
 0x193   :  { %v5491_v56 = vadd.f32 %v606_v55, %v5464_v16  ;;  %v4394_v59 = vpop.f32.mrb[25].mxu0  ;;  %v4711_v55 = vld [vmem:[#allocation11 + $0x80] ss:$12 sps:$4 sm:$0xff]  }
 0x194   :  { %v609_v60 = vpop.f32.mrb[26].mxu0  ;;  %v5541_v59 = vld [vmem:[#allocation12 + $0x64] ss:$8 sps:$4 sm:$0xff]   ;;  %4431 = vmatpush3.bf16.msra.mxu0 %v4711_v55 }
 0x195   :  { %6045 = vst [vmem:[#allocation24_spill] sm:$0xff] %v5491_v56  ;;  %v5494_v61 = vadd.f32 %v609_v60, %v5464_v16  ;;  %v4395_v63 = vpop.f32.mrb[27].mxu0  ;;  %v5545_v60 = vld [vmem:[#allocation12 + $0x60] ss:$8 sps:$4 sm:$0xff]   ;;  %1089 = vmatprep.subr.bf16.mxu1 %v5541_v59  ;;  %4432 = vmatprep.subr.bf16.mxu0 %v6035_v0 }
 0x196   :  { %v4715_v63 = vld [vmem:[#allocation11 + $0x98] ss:$12 sps:$4 sm:$0xff]   ;;  %1090 = vmatpush1.bf16.msra.mxu1 %v5545_v60 }
 0x197   :  { %6046 = vst [vmem:[#allocation25_spill] sm:$0xff] %v5494_v61 }
 0x198   :  { %4433 = vmatpush3.bf16.msra.mxu0 %v4715_v63 }
 0x199   :  { %4434 = vmatprep.subr.bf16.mxu0 %v6035_v0 }
 0x19a   :  { %v614_v2 = vpop.f32.mrb[28].mxu0 }
 0x19b   :  { %v5497_v4 = vadd.f32 %v614_v2, %v5464_v16  ;;  %v4398_v7 = vpop.f32.mrb[29].mxu0  ;;  %v5548_v2 = vld [vmem:[#allocation12 + $0x74] ss:$8 sps:$4 sm:$0xff]  }
 0x19c   :  { %v617_v8 = vpop.f32.mrb[30].mxu0  ;;  %v5552_v7 = vld [vmem:[#allocation12 + $0x70] ss:$8 sps:$4 sm:$0xff]   ;;  %1091 = vmatprep.subr.bf16.mxu1 %v5548_v2 }
 0x19d   :  { %6047 = vst [vmem:[#allocation26_spill] sm:$0xff] %v5497_v4  ;;  %v5500_v11 = vadd.f32 %v617_v8, %v5464_v16  ;;  %v4399_v13 = vpop.f32.mrb[31].mxu0  ;;  %v4719_v8 = vld [vmem:[#allocation11 + $0xb0] ss:$12 sps:$4 sm:$0xff]   ;;  %1092 = vmatpush1.bf16.msra.mxu1 %v5552_v7 }
 0x19e   :  { %4435 = vmatpush3.bf16.msra.mxu0 %v4719_v8  ;;  %1293 = vmatprep.subr.bf16.mxu1 %v5356_v28  ;;  %v5560_v13 = vsub.s32 0, %v5451_v9 }
 0x19f   :  { %6048 = vst [vmem:[#allocation27_spill] sm:$0xff] %v5500_v11  ;;  %1537 = vmatprep.subr.bf16.mxu0 %v5502_v14 }
 0x1a0   :  { %v5567_v23 = vrot.slane %v5461_v15, %v5560_v13 }
 0x226   :  { %v867_v29 = vpop.f32.mrb[0].mxu1  ;;  %v910_v39 = vpop.f32.mrb[32].mxu0 }
 0x227   :  { %v4540_v28 = vadd.f32 %v867_v29, %v5567_v23  ;;  %v869_v55 = vpop.f32.mrb[1].mxu1  ;;  %v4418_v63 = vpop.f32.mrb[33].mxu0 }
 0x228   :  { %v871_v8 = vpop.f32.mrb[2].mxu1  ;;  %v913_v0 = vpop.f32.mrb[34].mxu0  ;;  %v4541_v11 = vadd.f32 %v869_v55, %v5571_v50 }
 0x229   :  { %v3976_v1 = vmul.f32 -1.442695, %v4540_v28  ;;  %v4542_v9 = vadd.f32 %v871_v8, %v5567_v23  ;;  %v873_v6 = vpop.f32.mrb[3].mxu1  ;;  %v4419_v5 = vpop.f32.mrb[35].mxu0 }
 0x22a   :  { %v4543_v61 = vadd.f32 %v873_v6, %v5571_v50  ;;  %v3978_v15 = vmul.f32 -1.442695, %v4541_v11 }
 0x22b   :  { %4856 = vpow2.f32 %v3976_v1  ;;  %v3977_v4 = vmul.f32 -1.442695, %v4542_v9  ;;  %v5580_v1 = vld [vmem:[%s6031_s7] ss:$0 sm:$0xff]  ;;  %v570_v9 = vadd.f32 %v5455_v12, %v5464_v16 }
 0x22c   :  { %v3979_v56 = vmul.f32 -1.442695, %v4543_v61  ;;  %v952_v6 = vadd.f32 %v5580_v1, %v910_v39 }
 0x22d   :  { %4858 = vpow2.f32 %v3977_v4 }
 0x22e   :  { %4860 = vpow2.f32 %v3978_v15 }
 0x22f   :  { %4862 = vpow2.f32 %v3979_v56  ;;  %v567_v56 = vadd.f32 %v5453_v10, %v5464_v16 }
 0x235   :  { %v4857_v29 = vpop.eup %4856 }
 0x236   :  { %v925_v63 = vadd.f32 1.0, %v4857_v29 }
 0x237   :  { %v4859_v53 = vpop.eup %4858 }
 0x238   :  { %4864 = vrcp.f32 %v925_v63  ;;  %v926_v28 = vadd.f32 1.0, %v4859_v53  ;;  %v4861_v8 = vpop.eup %4860  ;;  %v953_v53 = vadd.f32 %v5580_v1, %v913_v0 }
 0x239   :  { %v4863_v49 = vpop.eup %4862  ;;  %v939_v5 = vadd.f32 1.0, %v4861_v8 }
 0x23a   :  { %4866 = vrcp.f32 %v926_v28  ;;  %v940_v4 = vadd.f32 1.0, %v4863_v49 }
 0x23b   :  { %4868 = vrcp.f32 %v939_v5  ;;  %v6049_v5 = vmax.f32 %v5438_v62, 0.0  ;;  %v4996_v62 = vld [vmem:[#allocation11 + $0x4] ss:$12 sps:$4 sm:$0xff]  }
 0x23c   :  { %4870 = vrcp.f32 %v940_v4 }
 0x242   :  { %v4865_v61 = vpop.eup %4864 }
 0x243   :  { %v954_v11 = vmul.f32 %v4865_v61, %v952_v6 }
 0x244   :  { %v4867_v55 = vpop.eup %4866 }
 0x245   :  { %v956_v15 = vadd.f32 %v954_v11, %v567_v56  ;;  %v955_v29 = vmul.f32 %v4867_v55, %v953_v53  ;;  %v4869_v39 = vpop.eup %4868  ;;  %v6051_v11 = vmov 0  }
 0x246   :  { %v4871_v49 = vpop.eup %4870  ;;  %v960_v28 = vsub.f32 1.0, %v4869_v39  ;;  %v964_v6 = vmul.f32 %v4869_v39, %v6049_v5 }
 0x247   :  { %4872 = vtanh.f32 %v956_v15  ;;  %v957_v63 = vadd.f32 %v955_v29, %v570_v9  ;;  %v961_v42 = vsub.f32 1.0, %v4871_v49  ;;  %v965_v12 = vmul.f32 %v4871_v49, %v6050_v35 }
 0x249   :  { %4874 = vtanh.f32 %v957_v63 }
 0x251   :  { %v4873_v8 = vpop.eup %4872 }
 0x252   :  { %v962_v10 = vmul.f32 %v4873_v8, %v960_v28 }
 0x253   :  { %v4875_v0 = vpop.eup %4874 }
 0x254   :  { %v963_v61 = vmul.f32 %v4875_v0, %v961_v42  ;;  %v5592_v16 = vadd.f32 %v964_v6, %v962_v10 }
 0x256   :  { %v5594_v4 = vadd.f32 %v965_v12, %v963_v61 }
 0x258   :  { %v968_v56 = vpack.c.bf16 %v5594_v4, %v5592_v16 }
 0x25a   :  { %1110 = vmatmul.mubr.bf16.vlgmr.msra.gmra.mrb[28].mxu1 %v968_v56  ;;  %4437 = vmatmul.mubr.bf16.vlgmr.msra.gmra.mrb[36].mxu0 %v968_v56 }
 0x25b   :  { %1294 = vmatpush1.bf16.msra.mxu1 %v5358_v31  ;;  %1325 = vmatprep.mubr.bf16.mxu1 %v6051_v11 }
 0x25c   :  { %1295 = vmatprep.subr.bf16.mxu1 %v5362_v32  ;;  %1538 = vmatpush1.bf16.msra.mxu0 %v5504_v17 }
 0x25d   :  { %1539 = vmatprep.subr.bf16.mxu0 %v5508_v20  ;;  %1569 = vmatprep.mubr.bf16.mxu0 %v6051_v11 }
 0x25f   :  { %1296 = vmatpush1.bf16.msra.mxu1 %v5364_v33 }
 0x260   :  { %1297 = vmatprep.subr.bf16.mxu1 %v5367_v34  ;;  %1540 = vmatpush1.bf16.msra.mxu0 %v5510_v22 }
 0x261   :  { %1541 = vmatprep.subr.bf16.mxu0 %v5515_v25 }
 0x263   :  { %1298 = vmatpush1.bf16.msra.mxu1 %v5372_v37 }
 0x264   :  { %1299 = vmatprep.subr.bf16.mxu1 %v5377_v38  ;;  %1542 = vmatpush1.bf16.msra.mxu0 %v5517_v26 }
 0x265   :  { %1543 = vmatprep.subr.bf16.mxu0 %v5522_v30 }
 0x267   :  { %1300 = vmatpush1.bf16.msra.mxu1 %v5380_v40 }
 0x268   :  { %1301 = vmatprep.subr.bf16.mxu1 %v5383_v41  ;;  %1544 = vmatpush1.bf16.msra.mxu0 %v5524_v36 }
 0x269   :  { %1545 = vmatprep.subr.bf16.mxu0 %v5529_v43 }
 0x26b   :  { %1302 = vmatpush1.bf16.msra.mxu1 %v5388_v44 }
 0x26c   :  { %1303 = vmatprep.subr.bf16.mxu1 %v5391_v45  ;;  %1546 = vmatpush1.bf16.msra.mxu0 %v5531_v46 }
 0x26d   :  { %1547 = vmatprep.subr.bf16.mxu0 %v5535_v52 }
 0x26f   :  { %1304 = vmatpush1.bf16.msra.mxu1 %v5397_v47 }
 0x270   :  { %1305 = vmatprep.subr.bf16.mxu1 %v5400_v48  ;;  %1548 = vmatpush1.bf16.msra.mxu0 %v5538_v54 }
 0x271   :  { %1549 = vmatprep.subr.bf16.mxu0 %v5541_v59 }
 0x273   :  { %1306 = vmatpush1.bf16.msra.mxu1 %v5406_v51 }
 0x274   :  { %1307 = vmatprep.subr.bf16.mxu1 %v5427_v58  ;;  %1550 = vmatpush1.bf16.msra.mxu0 %v5545_v60 }
 0x275   :  { %1551 = vmatprep.subr.bf16.mxu0 %v5548_v2 }
 0x277   :  { %1308 = vmatpush1.bf16.msra.mxu1 %v5425_v57 }
 0x278   :  { %1754 = vmatprep.subr.bf16.mxu1 %v4996_v62  ;;  %1552 = vmatpush1.bf16.msra.mxu0 %v5552_v7 }
 0x279   :  { %4440 = vmatprep.subr.bf16.mxu0 %v6052_v3 }
 0x27a   :  { %1326 = vmatmul.mubr.bf16.vlgmr.msra.gmra.mrb[4].mxu1 %v968_v56 }
 0x27b   :  { %1755 = vmatpush1.bf16.msra.mxu1 %v5358_v31  ;;  %1786 = vmatprep.mubr.bf16.mxu1 %v6051_v11  ;;  %v985_v31 = vld [vmem:[%s6033_s9] sm:$0x3] }
 0x27c   :  { %1756 = vmatprep.subr.bf16.mxu1 %v5362_v32  ;;  %v990_v32 = vrot.slane %v985_v31, %v5560_v13 }
 0x27f   :  { %1757 = vmatpush1.bf16.msra.mxu1 %v5364_v33  ;;  %v994_v33 = vrot.slane %v985_v31, %v5563_v19 }
 0x280   :  { %1758 = vmatprep.subr.bf16.mxu1 %v5367_v34 }
 0x283   :  { %1759 = vmatpush1.bf16.msra.mxu1 %v5372_v37 }
 0x284   :  { %1760 = vmatprep.subr.bf16.mxu1 %v5377_v38 }
 0x287   :  { %1761 = vmatpush1.bf16.msra.mxu1 %v5380_v40 }
 0x288   :  { %1762 = vmatprep.subr.bf16.mxu1 %v5383_v41 }
 0x28b   :  { %1763 = vmatpush1.bf16.msra.mxu1 %v5388_v44 }
 0x28c   :  { %1764 = vmatprep.subr.bf16.mxu1 %v5391_v45 }
 0x28f   :  { %1765 = vmatpush1.bf16.msra.mxu1 %v5397_v47 }
 0x290   :  { %1766 = vmatprep.subr.bf16.mxu1 %v5400_v48 }
 0x293   :  { %1767 = vmatpush1.bf16.msra.mxu1 %v5406_v51 }
 0x294   :  { %1768 = vmatprep.subr.bf16.mxu1 %v5427_v58 }
 0x297   :  { %1769 = vmatpush1.bf16.msra.mxu1 %v5425_v57 }
 0x298   :  { %1998 = vmatprep.subr.bf16.mxu1 %v5502_v14 }
 0x32d   :  { %v1111_v34 = vpop.f32.mrb[28].mxu1  ;;  %v1370_v37 = vpop.f32.mrb[36].mxu0 }
 0x32e   :  { %v1112_v38 = vadd.f32 %v1111_v34, %v990_v32  ;;  %v1113_v40 = vpop.f32.mrb[29].mxu1  ;;  %v4438_v41 = vpop.f32.mrb[37].mxu0  ;;  %v1412_v56 = vadd.f32 %v5580_v1, %v1370_v37 }
 0x32f   :  { %v1114_v44 = vadd.f32 %v1113_v40, %v994_v33  ;;  %v1115_v45 = vpop.f32.mrb[30].mxu1  ;;  %v1373_v47 = vpop.f32.mrb[38].mxu0 }
 0x330   :  { %1120 = vst [vmem:[#allocation14] sm:$0xff] %v1112_v38  ;;  %v1116_v48 = vadd.f32 %v1115_v45, %v990_v32  ;;  %v1117_v51 = vpop.f32.mrb[31].mxu1  ;;  %v4439_v57 = vpop.f32.mrb[39].mxu0  ;;  %v1413_v32 = vadd.f32 %v5580_v1, %v1373_v47 }
 0x331   :  { %1121 = vst [vmem:[#allocation14 + $0x8] sm:$0xff] %v1114_v44  ;;  %v1118_v58 = vadd.f32 %v1117_v51, %v994_v33 }
 0x332   :  { %1122 = vst [vmem:[#allocation14 + $0x70] sm:$0xff] %v1116_v48 }
 0x333   :  { %1123 = vst [vmem:[#allocation14 + $0x78] sm:$0xff] %v1118_v58 }
 0x34d   :  { %v1327_v35 = vpop.f32.mrb[4].mxu1 }
 0x34e   :  { %v4544_v42 = vadd.f32 %v1327_v35, %v5567_v23  ;;  %v1329_v14 = vpop.f32.mrb[5].mxu1 }
 0x34f   :  { %v1331_v53 = vpop.f32.mrb[6].mxu1  ;;  %v4545_v29 = vadd.f32 %v1329_v14, %v5571_v50 }
 0x350   :  { %v4021_v55 = vmul.f32 -1.442695, %v4544_v42  ;;  %v4546_v9 = vadd.f32 %v1331_v53, %v5567_v23  ;;  %v1333_v15 = vpop.f32.mrb[7].mxu1  ;;  %v4720_v53 = vld [vmem:[#allocation11 + $0x8] ss:$12 sps:$4 sm:$0xff]  }
 0x351   :  { %v4547_v39 = vadd.f32 %v1333_v15, %v5571_v50  ;;  %v4023_v49 = vmul.f32 -1.442695, %v4545_v29 }
 0x352   :  { %4876 = vpow2.f32 %v4021_v55  ;;  %v4022_v63 = vmul.f32 -1.442695, %v4546_v9  ;;  %v4721_v55 = vld [vmem:[#allocation11 + $0x20] ss:$12 sps:$4 sm:$0xff]  }
 0x353   :  { %v4024_v28 = vmul.f32 -1.442695, %v4547_v39 }
 0x354   :  { %4878 = vpow2.f32 %v4022_v63 }
 0x355   :  { %4880 = vpow2.f32 %v4023_v49 }
 0x356   :  { %4882 = vpow2.f32 %v4024_v28 }
 0x35c   :  { %v4877_v8 = vpop.eup %4876 }
 0x35d   :  { %v1385_v10 = vadd.f32 1.0, %v4877_v8 }
 0x35e   :  { %v4879_v5 = vpop.eup %4878 }
 0x35f   :  { %4884 = vrcp.f32 %v1385_v10  ;;  %v1386_v6 = vadd.f32 1.0, %v4879_v5  ;;  %v4881_v0 = vpop.eup %4880 }
 0x360   :  { %v4883_v61 = vpop.eup %4882  ;;  %v1399_v12 = vadd.f32 1.0, %v4881_v0 }
 0x361   :  { %4886 = vrcp.f32 %v1386_v6  ;;  %v1400_v62 = vadd.f32 1.0, %v4883_v61 }
 0x362   :  { %4888 = vrcp.f32 %v1399_v12 }
 0x363   :  { %4890 = vrcp.f32 %v1400_v62 }
 0x369   :  { %v4885_v31 = vpop.eup %4884 }
 0x36a   :  { %v1414_v33 = vmul.f32 %v4885_v31, %v1412_v56 }
 0x36b   :  { %v4887_v34 = vpop.eup %4886 }
 0x36c   :  { %v1416_v38 = vadd.f32 %v1414_v33, %v5467_v18  ;;  %v1415_v40 = vmul.f32 %v4887_v34, %v1413_v32  ;;  %v4889_v44 = vpop.eup %4888 }
 0x36d   :  { %v4891_v45 = vpop.eup %4890  ;;  %v1420_v48 = vsub.f32 1.0, %v4889_v44  ;;  %v1424_v58 = vmul.f32 %v4889_v44, %v5592_v16  ;;  %v4722_v16 = vld [vmem:[#allocation11 + $0x38] ss:$12 sps:$4 sm:$0xff]  }
 0x36e   :  { %4892 = vtanh.f32 %v1416_v38  ;;  %v1417_v41 = vadd.f32 %v1415_v40, %v5470_v21  ;;  %v1421_v37 = vsub.f32 1.0, %v4891_v45  ;;  %v1425_v42 = vmul.f32 %v4891_v45, %v5594_v4  ;;  %v4723_v4 = vld [vmem:[#allocation11 + $0x50] ss:$12 sps:$4 sm:$0xff]  }
 0x370   :  { %4894 = vtanh.f32 %v1417_v41 }
 0x378   :  { %v4893_v51 = vpop.eup %4892 }
 0x379   :  { %v1422_v57 = vmul.f32 %v4893_v51, %v1420_v48 }
 0x37a   :  { %v4895_v47 = vpop.eup %4894 }
 0x37b   :  { %v1423_v35 = vmul.f32 %v4895_v47, %v1421_v37  ;;  %v5663_v14 = vadd.f32 %v1424_v58, %v1422_v57 }
 0x37d   :  { %v5665_v18 = vadd.f32 %v1425_v42, %v1423_v35 }
 0x37f   :  { %v1428_v21 = vpack.c.bf16 %v5665_v18, %v5663_v14 }
 0x381   :  { %1570 = vmatmul.mubr.bf16.vlgmr.msra.gmra.mrb[40].mxu0 %v1428_v21  ;;  %1787 = vmatmul.mubr.bf16.vlgmr.msra.gmra.mrb[8].mxu1 %v1428_v21 }
 0x382   :  { %4441 = vmatpush3.bf16.msra.mxu0 %v4720_v53  ;;  %4456 = vmatprep.mubr.msk.bf16.mxu0 %vm5174_vm0, %v6052_v3 }
 0x383   :  { %4442 = vmatprep.subr.bf16.mxu0 %v6052_v3  ;;  %1999 = vmatpush1.bf16.msra.mxu1 %v5504_v17  ;;  %v4724_v17 = vld [vmem:[#allocation11 + $0x68] ss:$12 sps:$4 sm:$0xff]  }
 0x384   :  { %2000 = vmatprep.subr.bf16.mxu1 %v5508_v20  ;;  %2030 = vmatprep.mubr.bf16.mxu1 %v6051_v11  ;;  %v4725_v20 = vld [vmem:[#allocation11 + $0x80] ss:$12 sps:$4 sm:$0xff]  }
 0x386   :  { %4443 = vmatpush3.bf16.msra.mxu0 %v4721_v55 }
 0x387   :  { %4444 = vmatprep.subr.bf16.mxu0 %v6052_v3  ;;  %2001 = vmatpush1.bf16.msra.mxu1 %v5510_v22  ;;  %v4726_v22 = vld [vmem:[#allocation11 + $0x98] ss:$12 sps:$4 sm:$0xff]  }
 0x388   :  { %2002 = vmatprep.subr.bf16.mxu1 %v5515_v25  ;;  %v4727_v25 = vld [vmem:[#allocation11 + $0xb0] ss:$12 sps:$4 sm:$0xff]  }
 0x38a   :  { %4445 = vmatpush3.bf16.msra.mxu0 %v4722_v16 }
 0x38b   :  { %4446 = vmatprep.subr.bf16.mxu0 %v6052_v3  ;;  %2003 = vmatpush1.bf16.msra.mxu1 %v5517_v26  ;;  %v4728_v26 = vld [vmem:[#allocation11 + $0x8] ss:$12 sps:$4 sm:$0xff]  }
 0x38c   :  { %2004 = vmatprep.subr.bf16.mxu1 %v5522_v30  ;;  %v4729_v30 = vld [vmem:[#allocation11 + $0x20] ss:$12 sps:$4 sm:$0xff]  }
 0x38e   :  { %4447 = vmatpush3.bf16.msra.mxu0 %v4723_v4 }
 0x38f   :  { %4448 = vmatprep.subr.bf16.mxu0 %v6052_v3  ;;  %2005 = vmatpush1.bf16.msra.mxu1 %v5524_v36  ;;  %v4730_v36 = vld [vmem:[#allocation11 + $0x38] ss:$12 sps:$4 sm:$0xff]  }
 0x390   :  { %2006 = vmatprep.subr.bf16.mxu1 %v5529_v43  ;;  %v4731_v43 = vld [vmem:[#allocation11 + $0x50] ss:$12 sps:$4 sm:$0xff]  }
 0x392   :  { %4449 = vmatpush3.bf16.msra.mxu0 %v4724_v17 }
 0x393   :  { %4450 = vmatprep.subr.bf16.mxu0 %v6052_v3  ;;  %2007 = vmatpush1.bf16.msra.mxu1 %v5531_v46  ;;  %v4732_v46 = vld [vmem:[#allocation11 + $0x68] ss:$12 sps:$4 sm:$0xff]  }
 0x394   :  { %2008 = vmatprep.subr.bf16.mxu1 %v5535_v52  ;;  %v5701_v52 = vld [vmem:[#allocation11 + $0x4] ss:$12 sps:$4 sm:$0xff]  }
 0x396   :  { %4451 = vmatpush3.bf16.msra.mxu0 %v4725_v20 }
 0x397   :  { %4452 = vmatprep.subr.bf16.mxu0 %v6052_v3  ;;  %2009 = vmatpush1.bf16.msra.mxu1 %v5538_v54  ;;  %v4733_v54 = vld [vmem:[#allocation11 + $0x80] ss:$12 sps:$4 sm:$0xff]  }
 0x398   :  { %2010 = vmatprep.subr.bf16.mxu1 %v5541_v59  ;;  %v4734_v59 = vld [vmem:[#allocation11 + $0x98] ss:$12 sps:$4 sm:$0xff]  }
 0x39a   :  { %4453 = vmatpush3.bf16.msra.mxu0 %v4726_v22 }
 0x39b   :  { %4454 = vmatprep.subr.bf16.mxu0 %v6052_v3  ;;  %2011 = vmatpush1.bf16.msra.mxu1 %v5545_v60  ;;  %v4735_v60 = vld [vmem:[#allocation11 + $0xb0] ss:$12 sps:$4 sm:$0xff]  }
 0x39c   :  { %2012 = vmatprep.subr.bf16.mxu1 %v5548_v2  ;;  %v1445_v2 = vld [vmem:[%s6033_s9] sm:$0x3] }
 0x39d   :  { %v1454_v9 = vrot.slane %v1445_v2, %v5563_v19 }
 0x39e   :  { %4455 = vmatpush3.bf16.msra.mxu0 %v4727_v25 }
 0x39f   :  { %4460 = vmatprep.subr.bf16.mxu0 %v6052_v3  ;;  %2013 = vmatpush1.bf16.msra.mxu1 %v5552_v7  ;;  %v1450_v7 = vrot.slane %v1445_v2, %v5560_v13 }
 0x3a0   :  { %2215 = vmatprep.subr.bf16.mxu1 %v5701_v52 }
 0x3a1   :  { %4457 = vmatmul.mubr.bf16.vlgmr.msra.gmra.mrb[44].mxu0 %v1428_v21 }
 0x3a2   :  { %4476 = vmatprep.mubr.msk.bf16.mxu0 %vm5174_vm0, %v6052_v3  ;;  %4461 = vmatpush3.bf16.msra.mxu0 %v4728_v26 }
 0x3a3   :  { %4462 = vmatprep.subr.bf16.mxu0 %v6052_v3 }
 0x3a6   :  { %4463 = vmatpush3.bf16.msra.mxu0 %v4729_v30 }
 0x3a7   :  { %4464 = vmatprep.subr.bf16.mxu0 %v6052_v3 }
 0x3aa   :  { %4465 = vmatpush3.bf16.msra.mxu0 %v4730_v36 }
 0x3ab   :  { %4466 = vmatprep.subr.bf16.mxu0 %v6052_v3 }
 0x3ae   :  { %4467 = vmatpush3.bf16.msra.mxu0 %v4731_v43 }
 0x3af   :  { %4468 = vmatprep.subr.bf16.mxu0 %v6052_v3 }
 0x3b2   :  { %4469 = vmatpush3.bf16.msra.mxu0 %v4732_v46 }
 0x3b3   :  { %4470 = vmatprep.subr.bf16.mxu0 %v6052_v3 }
 0x3b6   :  { %4471 = vmatpush3.bf16.msra.mxu0 %v4733_v54 }
 0x3b7   :  { %4472 = vmatprep.subr.bf16.mxu0 %v6052_v3 }
 0x3ba   :  { %4473 = vmatpush3.bf16.msra.mxu0 %v4734_v59 }
 0x3bb   :  { %4474 = vmatprep.subr.bf16.mxu0 %v6052_v3 }
 0x3be   :  { %4475 = vmatpush3.bf16.msra.mxu0 %v4735_v60 }
 0x454   :  { %v1571_v15 = vpop.f32.mrb[40].mxu0  ;;  %v1788_v29 = vpop.f32.mrb[8].mxu1 }
 0x455   :  { %v1572_v63 = vadd.f32 %v1571_v15, %v1450_v7  ;;  %v4548_v39 = vadd.f32 %v1788_v29, %v5567_v23  ;;  %v1573_v49 = vpop.f32.mrb[41].mxu0  ;;  %v1790_v28 = vpop.f32.mrb[9].mxu1  ;;  %v5741_v15 = vld [vmem:[#allocation11 + $0x30] ss:$12 sps:$4 sm:$0xff]   ;;  %v5744_v29 = vld [vmem:[#allocation11 + $0x4c] ss:$12 sps:$4 sm:$0xff]  }
 0x456   :  { %v1574_v8 = vadd.f32 %v1573_v49, %v1454_v9  ;;  %v1575_v10 = vpop.f32.mrb[42].mxu0  ;;  %v1792_v5 = vpop.f32.mrb[10].mxu1  ;;  %v4549_v32 = vadd.f32 %v1790_v28, %v5571_v50  ;;  %v5753_v49 = vld [vmem:[#allocation11 + $0x60] ss:$12 sps:$4 sm:$0xff]   ;;  %v5756_v28 = vld [vmem:[#allocation11 + $0x7c] ss:$12 sps:$4 sm:$0xff]  }
 0x457   :  { %1581 = vst [vmem:[#allocation14 + $0x10] sm:$0xff] %v1572_v63  ;;  %v4066_v6 = vmul.f32 -1.442695, %v4548_v39  ;;  %v1576_v0 = vadd.f32 %v1575_v10, %v1450_v7  ;;  %v4550_v61 = vadd.f32 %v1792_v5, %v5567_v23  ;;  %v1577_v12 = vpop.f32.mrb[43].mxu0  ;;  %v1794_v56 = vpop.f32.mrb[11].mxu1 }
 0x458   :  { %1582 = vst [vmem:[#allocation14 + $0x18] sm:$0xff] %v1574_v8  ;;  %v1578_v62 = vadd.f32 %v1577_v12, %v1454_v9  ;;  %v4551_v33 = vadd.f32 %v1794_v56, %v5571_v50  ;;  %v4068_v34 = vmul.f32 -1.442695, %v4549_v32  ;;  %v5726_v7 = vld [vmem:[#allocation11] ss:$12 sps:$4 sm:$0xff]  }
 0x459   :  { %1583 = vst [vmem:[#allocation14 + $0x80] sm:$0xff] %v1576_v0  ;;  %v4067_v31 = vmul.f32 -1.442695, %v4550_v61  ;;  %4896 = vpow2.f32 %v4066_v6  ;;  %v5730_v9 = vld [vmem:[#allocation11 + $0x1c] ss:$12 sps:$4 sm:$0xff]  }
 0x45a   :  { %1584 = vst [vmem:[#allocation14 + $0x88] sm:$0xff] %v1578_v62  ;;  %v4069_v38 = vmul.f32 -1.442695, %v4551_v33  ;;  %v5747_v63 = vld [vmem:[#allocation11 + $0x48] ss:$12 sps:$4 sm:$0xff]  }
 0x45b   :  { %4898 = vpow2.f32 %v4067_v31  ;;  %v5750_v39 = vld [vmem:[#allocation11 + $0x64] ss:$12 sps:$4 sm:$0xff]   ;;  %v5762_v10 = vld [vmem:[#allocation11 + $0x94] ss:$12 sps:$4 sm:$0xff]   ;;  %v5768_v6 = vld [vmem:[#allocation11 + $0xac] ss:$12 sps:$4 sm:$0xff]  }
 0x45c   :  { %4900 = vpow2.f32 %v4068_v34  ;;  %v5759_v8 = vld [vmem:[#allocation11 + $0x78] ss:$12 sps:$4 sm:$0xff]   ;;  %v5765_v5 = vld [vmem:[#allocation11 + $0x90] ss:$12 sps:$4 sm:$0xff]   ;;  %v5771_v0 = vld [vmem:[#allocation11 + $0xa8] ss:$12 sps:$4 sm:$0xff]  }
 0x45d   :  { %4902 = vpow2.f32 %v4069_v38  ;;  %v5792_v61 = vld [vmem:[#allocation12 + $0x4] ss:$8 sps:$4 sm:$0xff]   ;;  %v5794_v12 = vld [vmem:[#allocation12] ss:$8 sps:$4 sm:$0xff]   ;;  %v5799_v56 = vld [vmem:[#allocation12 + $0x14] ss:$8 sps:$4 sm:$0xff]  }
 0x45e   :  { %2459 = vmatprep.subr.bf16.mxu0 %v5792_v61  ;;  %v5801_v62 = vld [vmem:[#allocation12 + $0x10] ss:$8 sps:$4 sm:$0xff]   ;;  %v5805_v31 = vld [vmem:[#allocation12 + $0x24] ss:$8 sps:$4 sm:$0xff]   ;;  %v5807_v32 = vld [vmem:[#allocation12 + $0x20] ss:$8 sps:$4 sm:$0xff]  }
 0x45f   :  { %v5811_v33 = vld [vmem:[#allocation12 + $0x34] ss:$8 sps:$4 sm:$0xff]   ;;  %v5813_v34 = vld [vmem:[#allocation12 + $0x30] ss:$8 sps:$4 sm:$0xff]   ;;  %v5817_v38 = vld [vmem:[#allocation12 + $0x44] ss:$8 sps:$4 sm:$0xff]  }
 0x463   :  { %v4897_v40 = vpop.eup %4896 }
 0x464   :  { %v1846_v44 = vadd.f32 1.0, %v4897_v40  ;;  %v5819_v40 = vld [vmem:[#allocation12 + $0x40] ss:$8 sps:$4 sm:$0xff]  }
 0x465   :  { %v4899_v41 = vpop.eup %4898 }
 0x466   :  { %v1847_v45 = vadd.f32 1.0, %v4899_v41  ;;  %4904 = vrcp.f32 %v1846_v44  ;;  %v4901_v48 = vpop.eup %4900  ;;  %v5822_v41 = vld [vmem:[#allocation12 + $0x54] ss:$8 sps:$4 sm:$0xff]   ;;  %v5825_v44 = vld [vmem:[#allocation12 + $0x50] ss:$8 sps:$4 sm:$0xff]  }
 0x467   :  { %v4903_v51 = vpop.eup %4902  ;;  %v1860_v37 = vadd.f32 1.0, %v4901_v48  ;;  %v5831_v48 = vld [vmem:[#allocation12 + $0x60] ss:$8 sps:$4 sm:$0xff]  }
 0x468   :  { %4906 = vrcp.f32 %v1847_v45  ;;  %v1861_v58 = vadd.f32 1.0, %v4903_v51  ;;  %v5828_v45 = vld [vmem:[#allocation12 + $0x64] ss:$8 sps:$4 sm:$0xff]   ;;  %v5834_v51 = vld [vmem:[#allocation12 + $0x74] ss:$8 sps:$4 sm:$0xff]  }
 0x469   :  { %4908 = vrcp.f32 %v1860_v37  ;;  %v5837_v37 = vld [vmem:[#allocation12 + $0x70] ss:$8 sps:$4 sm:$0xff]  }
 0x46a   :  { %4910 = vrcp.f32 %v1861_v58 }
 0x470   :  { %v4905_v42 = vpop.eup %4904 }
 0x472   :  { %v4907_v4 = vpop.eup %4906 }
 0x473   :  { %v4909_v25 = vpop.eup %4908 }
 0x474   :  { %v1831_v57 = vpop.f32.mrb[44].mxu0  ;;  %v4911_v26 = vpop.eup %4910  ;;  %v1881_v30 = vsub.f32 1.0, %v4909_v25  ;;  %v1885_v54 = vmul.f32 %v4909_v25, %v5663_v14  ;;  %v5733_v14 = vld [vmem:[#allocation11 + $0x18] ss:$12 sps:$4 sm:$0xff]  }
 0x475   :  { %v1873_v47 = vadd.f32 %v5580_v1, %v1831_v57  ;;  %v4458_v35 = vpop.f32.mrb[45].mxu0  ;;  %v1882_v43 = vsub.f32 1.0, %v4911_v26  ;;  %v1886_v60 = vmul.f32 %v4911_v26, %v5665_v18  ;;  %v5737_v18 = vld [vmem:[#allocation11 + $0x34] ss:$12 sps:$4 sm:$0xff]   ;;  %v1906_v57 = vld [vmem:[%s6033_s9] sm:$0x3] }
 0x476   :  { %v1834_v53 = vpop.f32.mrb[46].mxu0  ;;  %v1911_v58 = vrot.slane %v1906_v57, %v5560_v13 }
 0x477   :  { %v1875_v21 = vmul.f32 %v4905_v42, %v1873_v47  ;;  %v1874_v55 = vadd.f32 %v5580_v1, %v1834_v53  ;;  %v4459_v16 = vpop.f32.mrb[47].mxu0  ;;  %v1915_v47 = vrot.slane %v1906_v57, %v5563_v19 }
 0x479   :  { %v1877_v17 = vadd.f32 %v1875_v21, %v5473_v24  ;;  %v1876_v20 = vmul.f32 %v4907_v4, %v1874_v55 }
 0x47b   :  { %4912 = vtanh.f32 %v1877_v17  ;;  %v1878_v22 = vadd.f32 %v1876_v20, %v5476_v27 }
 0x47d   :  { %4914 = vtanh.f32 %v1878_v22 }
 0x485   :  { %v4913_v36 = vpop.eup %4912 }
 0x486   :  { %v1883_v46 = vmul.f32 %v4913_v36, %v1881_v30 }
 0x487   :  { %v4915_v59 = vpop.eup %4914 }
 0x488   :  { %v1884_v1 = vmul.f32 %v4915_v59, %v1882_v43  ;;  %v5722_v2 = vadd.f32 %v1885_v54, %v1883_v46 }
 0x48a   :  { %v5724_v24 = vadd.f32 %v1886_v60, %v1884_v1 }
 0x48c   :  { %v1889_v27 = vpack.c.bf16 %v5724_v24, %v5722_v2 }
 0x48e   :  { %2031 = vmatmul.mubr.bf16.vlgmr.msra.gmra.mrb[32].mxu1 %v1889_v27  ;;  %4477 = vmatmul.mubr.bf16.vlgmr.msra.gmra.mrb[48].mxu0 %v1889_v27 }
 0x48f   :  { %2216 = vmatpush1.bf16.msra.mxu1 %v5726_v7  ;;  %2247 = vmatprep.mubr.bf16.mxu1 %v6051_v11 }
 0x490   :  { %2217 = vmatprep.subr.bf16.mxu1 %v5730_v9  ;;  %2491 = vmatprep.mubr.bf16.mxu0 %v6051_v11 }
 0x491   :  { %2460 = vmatpush1.bf16.msra.mxu0 %v5794_v12 }
 0x492   :  { %2461 = vmatprep.subr.bf16.mxu0 %v5799_v56 }
 0x493   :  { %2218 = vmatpush1.bf16.msra.mxu1 %v5733_v14 }
 0x494   :  { %2219 = vmatprep.subr.bf16.mxu1 %v5737_v18 }
 0x495   :  { %2462 = vmatpush1.bf16.msra.mxu0 %v5801_v62 }
 0x496   :  { %2463 = vmatprep.subr.bf16.mxu0 %v5805_v31 }
 0x497   :  { %2220 = vmatpush1.bf16.msra.mxu1 %v5741_v15 }
 0x498   :  { %2221 = vmatprep.subr.bf16.mxu1 %v5744_v29 }
 0x499   :  { %2464 = vmatpush1.bf16.msra.mxu0 %v5807_v32 }
 0x49a   :  { %2465 = vmatprep.subr.bf16.mxu0 %v5811_v33 }
 0x49b   :  { %2222 = vmatpush1.bf16.msra.mxu1 %v5747_v63 }
 0x49c   :  { %2223 = vmatprep.subr.bf16.mxu1 %v5750_v39 }
 0x49d   :  { %2466 = vmatpush1.bf16.msra.mxu0 %v5813_v34 }
 0x49e   :  { %2467 = vmatprep.subr.bf16.mxu0 %v5817_v38 }
 0x49f   :  { %2224 = vmatpush1.bf16.msra.mxu1 %v5753_v49 }
 0x4a0   :  { %2225 = vmatprep.subr.bf16.mxu1 %v5756_v28 }
 0x4a1   :  { %2468 = vmatpush1.bf16.msra.mxu0 %v5819_v40 }
 0x4a2   :  { %2469 = vmatprep.subr.bf16.mxu0 %v5822_v41 }
 0x4a3   :  { %2226 = vmatpush1.bf16.msra.mxu1 %v5759_v8 }
 0x4a4   :  { %2227 = vmatprep.subr.bf16.mxu1 %v5762_v10 }
 0x4a5   :  { %2470 = vmatpush1.bf16.msra.mxu0 %v5825_v44 }
 0x4a6   :  { %2471 = vmatprep.subr.bf16.mxu0 %v5828_v45 }
 0x4a7   :  { %2228 = vmatpush1.bf16.msra.mxu1 %v5765_v5 }
 0x4a8   :  { %2229 = vmatprep.subr.bf16.mxu1 %v5768_v6 }
 0x4a9   :  { %2472 = vmatpush1.bf16.msra.mxu0 %v5831_v48 }
 0x4aa   :  { %2473 = vmatprep.subr.bf16.mxu0 %v5834_v51 }
 0x4ab   :  { %2230 = vmatpush1.bf16.msra.mxu1 %v5771_v0 }
 0x4ac   :  { %2676 = vmatprep.subr.bf16.mxu1 %v5701_v52 }
 0x4ad   :  { %2474 = vmatpush1.bf16.msra.mxu0 %v5837_v37 }
 0x4ae   :  { %2248 = vmatmul.mubr.bf16.vlgmr.msra.gmra.mrb[12].mxu1 %v1889_v27  ;;  %4480 = vmatprep.subr.bf16.mxu0 %v6052_v3 }
 0x4af   :  { %2677 = vmatpush1.bf16.msra.mxu1 %v5726_v7  ;;  %2708 = vmatprep.mubr.bf16.mxu1 %v6051_v11 }
 0x4b0   :  { %2678 = vmatprep.subr.bf16.mxu1 %v5730_v9 }
 0x4b3   :  { %2679 = vmatpush1.bf16.msra.mxu1 %v5733_v14 }
 0x4b4   :  { %2680 = vmatprep.subr.bf16.mxu1 %v5737_v18 }
 0x4b7   :  { %2681 = vmatpush1.bf16.msra.mxu1 %v5741_v15 }
 0x4b8   :  { %2682 = vmatprep.subr.bf16.mxu1 %v5744_v29 }
 0x4bb   :  { %2683 = vmatpush1.bf16.msra.mxu1 %v5747_v63 }
 0x4bc   :  { %2684 = vmatprep.subr.bf16.mxu1 %v5750_v39 }
 0x4bf   :  { %2685 = vmatpush1.bf16.msra.mxu1 %v5753_v49 }
 0x4c0   :  { %2686 = vmatprep.subr.bf16.mxu1 %v5756_v28 }
 0x4c3   :  { %2687 = vmatpush1.bf16.msra.mxu1 %v5759_v8 }
 0x4c4   :  { %2688 = vmatprep.subr.bf16.mxu1 %v5762_v10 }
 0x4c7   :  { %2689 = vmatpush1.bf16.msra.mxu1 %v5765_v5 }
 0x4c8   :  { %2690 = vmatprep.subr.bf16.mxu1 %v5768_v6 }
 0x4cb   :  { %2691 = vmatpush1.bf16.msra.mxu1 %v5771_v0 }
 0x4cc   :  { %2920 = vmatprep.subr.bf16.mxu1 %v5792_v61 }
 0x561   :  { %v2032_v35 = vpop.f32.mrb[32].mxu1  ;;  %v2292_v42 = vpop.f32.mrb[48].mxu0 }
 0x562   :  { %v2033_v53 = vadd.f32 %v2032_v35, %v1911_v58  ;;  %v2034_v21 = vpop.f32.mrb[33].mxu1  ;;  %v4478_v55 = vpop.f32.mrb[49].mxu0 }
 0x563   :  { %v2035_v16 = vadd.f32 %v2034_v21, %v1915_v47  ;;  %v2036_v4 = vpop.f32.mrb[34].mxu1  ;;  %v2295_v17 = vpop.f32.mrb[50].mxu0 }
 0x564   :  { %2042 = vst [vmem:[#allocation14 + $0x20] sm:$0xff] %v2033_v53  ;;  %v2037_v20 = vadd.f32 %v2036_v4, %v1911_v58  ;;  %v2038_v22 = vpop.f32.mrb[35].mxu1  ;;  %v4479_v25 = vpop.f32.mrb[51].mxu0 }
 0x565   :  { %2043 = vst [vmem:[#allocation14 + $0x28] sm:$0xff] %v2035_v16  ;;  %v2039_v26 = vadd.f32 %v2038_v22, %v1915_v47 }
 0x566   :  { %2044 = vst [vmem:[#allocation14 + $0x90] sm:$0xff] %v2037_v20  ;;  %v5854_v20 = vld [vmem:[%s6031_s7] ss:$0 sm:$0xff] }
 0x567   :  { %2045 = vst [vmem:[#allocation14 + $0x98] sm:$0xff] %v2039_v26  ;;  %v2334_v25 = vadd.f32 %v5854_v20, %v2292_v42 }
 0x581   :  { %v2249_v30 = vpop.f32.mrb[12].mxu1 }
 0x582   :  { %v4552_v36 = vadd.f32 %v2249_v30, %v5567_v23  ;;  %v2251_v43 = vpop.f32.mrb[13].mxu1 }
 0x583   :  { %v2253_v46 = vpop.f32.mrb[14].mxu1  ;;  %v4553_v60 = vadd.f32 %v2251_v43, %v5571_v50 }
 0x584   :  { %v4111_v54 = vmul.f32 -1.442695, %v4552_v36  ;;  %v4554_v59 = vadd.f32 %v2253_v46, %v5567_v23  ;;  %v2255_v1 = vpop.f32.mrb[15].mxu1  ;;  %v2335_v36 = vadd.f32 %v5854_v20, %v2295_v17 }
 0x585   :  { %v4555_v57 = vadd.f32 %v2255_v1, %v5571_v50  ;;  %v4113_v58 = vmul.f32 -1.442695, %v4553_v60  ;;  %v6054_v60 = vld [vmem:[#allocation21_spill] sm:$0xff] }
 0x586   :  { %4916 = vpow2.f32 %v4111_v54  ;;  %v4112_v27 = vmul.f32 -1.442695, %v4554_v59  ;;  %v6053_v54 = vld [vmem:[#allocation20_spill] sm:$0xff] }
 0x587   :  { %v4114_v47 = vmul.f32 -1.442695, %v4555_v57 }
 0x588   :  { %4918 = vpow2.f32 %v4112_v27 }
 0x589   :  { %4920 = vpow2.f32 %v4113_v58 }
 0x58a   :  { %4922 = vpow2.f32 %v4114_v47 }
 0x590   :  { %v4917_v35 = vpop.eup %4916 }
 0x591   :  { %v2307_v53 = vadd.f32 1.0, %v4917_v35 }
 0x592   :  { %v4919_v21 = vpop.eup %4918 }
 0x593   :  { %4924 = vrcp.f32 %v2307_v53  ;;  %v2308_v55 = vadd.f32 1.0, %v4919_v21  ;;  %v4921_v16 = vpop.eup %4920 }
 0x594   :  { %v4923_v4 = vpop.eup %4922  ;;  %v2321_v22 = vadd.f32 1.0, %v4921_v16 }
 0x595   :  { %4926 = vrcp.f32 %v2308_v55  ;;  %v2322_v26 = vadd.f32 1.0, %v4923_v4 }
 0x596   :  { %4928 = vrcp.f32 %v2321_v22 }
 0x597   :  { %4930 = vrcp.f32 %v2322_v26 }
 0x59d   :  { %v4925_v30 = vpop.eup %4924 }
 0x59e   :  { %v2336_v43 = vmul.f32 %v4925_v30, %v2334_v25  ;;  %v4784_v25 = vld [vmem:[#allocation11 + $0x8] ss:$12 sps:$4 sm:$0xff]   ;;  %v4785_v30 = vld [vmem:[#allocation11 + $0x20] ss:$12 sps:$4 sm:$0xff]  }
 0x59f   :  { %v4927_v46 = vpop.eup %4926 }
 0x5a0   :  { %v2338_v59 = vadd.f32 %v2336_v43, %v6053_v54  ;;  %v2337_v1 = vmul.f32 %v4927_v46, %v2335_v36  ;;  %v4929_v57 = vpop.eup %4928  ;;  %v4788_v36 = vld [vmem:[#allocation11 + $0x68] ss:$12 sps:$4 sm:$0xff]   ;;  %v4789_v43 = vld [vmem:[#allocation11 + $0x80] ss:$12 sps:$4 sm:$0xff]   ;;  %v4790_v46 = vld [vmem:[#allocation11 + $0x98] ss:$12 sps:$4 sm:$0xff]  }
 0x5a1   :  { %v4931_v58 = vpop.eup %4930  ;;  %v2342_v47 = vsub.f32 1.0, %v4929_v57  ;;  %v2346_v21 = vmul.f32 %v4929_v57, %v5722_v2  ;;  %v4786_v2 = vld [vmem:[#allocation11 + $0x38] ss:$12 sps:$4 sm:$0xff]   ;;  %v4791_v54 = vld [vmem:[#allocation11 + $0xb0] ss:$12 sps:$4 sm:$0xff]  }
 0x5a2   :  { %4932 = vtanh.f32 %v2338_v59  ;;  %v2339_v27 = vadd.f32 %v2337_v1, %v6054_v60  ;;  %v2343_v42 = vsub.f32 1.0, %v4931_v58  ;;  %v2347_v16 = vmul.f32 %v4931_v58, %v5724_v24  ;;  %v4787_v24 = vld [vmem:[#allocation11 + $0x50] ss:$12 sps:$4 sm:$0xff]   ;;  %v4792_v59 = vld [vmem:[#allocation11 + $0x8] ss:$12 sps:$4 sm:$0xff]  }
 0x5a3   :  { %v4793_v1 = vld [vmem:[#allocation11 + $0x20] ss:$12 sps:$4 sm:$0xff]   ;;  %v4794_v60 = vld [vmem:[#allocation11 + $0x38] ss:$12 sps:$4 sm:$0xff]  }
 0x5a4   :  { %4934 = vtanh.f32 %v2339_v27  ;;  %v4795_v27 = vld [vmem:[#allocation11 + $0x50] ss:$12 sps:$4 sm:$0xff]   ;;  %v4797_v57 = vld [vmem:[#allocation11 + $0x80] ss:$12 sps:$4 sm:$0xff]   ;;  %v4798_v58 = vld [vmem:[#allocation11 + $0x98] ss:$12 sps:$4 sm:$0xff]  }
 0x5ac   :  { %v4933_v35 = vpop.eup %4932 }
 0x5ad   :  { %v2344_v53 = vmul.f32 %v4933_v35, %v2342_v47  ;;  %v4799_v47 = vld [vmem:[#allocation11 + $0xb0] ss:$12 sps:$4 sm:$0xff]  }
 0x5ae   :  { %v4935_v17 = vpop.eup %4934  ;;  %v2367_v35 = vld [vmem:[%s6033_s9] sm:$0x3] }
 0x5af   :  { %v2345_v55 = vmul.f32 %v4935_v17, %v2343_v42  ;;  %v5862_v4 = vadd.f32 %v2346_v21, %v2344_v53  ;;  %v2372_v42 = vrot.slane %v2367_v35, %v5560_v13  ;;  %v2376_v53 = vrot.slane %v2367_v35, %v5563_v19 }
 0x5b1   :  { %v5864_v22 = vadd.f32 %v2347_v16, %v2345_v55 }
 0x5b3   :  { %v2350_v26 = vpack.c.bf16 %v5864_v22, %v5862_v4 }
 0x5b5   :  { %2492 = vmatmul.mubr.bf16.vlgmr.msra.gmra.mrb[52].mxu0 %v2350_v26  ;;  %2709 = vmatmul.mubr.bf16.vlgmr.msra.gmra.mrb[16].mxu1 %v2350_v26 }
 0x5b6   :  { %4481 = vmatpush3.bf16.msra.mxu0 %v4784_v25  ;;  %4496 = vmatprep.mubr.msk.bf16.mxu0 %vm5174_vm0, %v6052_v3 }
 0x5b7   :  { %4482 = vmatprep.subr.bf16.mxu0 %v6052_v3  ;;  %2921 = vmatpush1.bf16.msra.mxu1 %v5794_v12 }
 0x5b8   :  { %2922 = vmatprep.subr.bf16.mxu1 %v5799_v56  ;;  %2952 = vmatprep.mubr.bf16.mxu1 %v6051_v11 }
 0x5ba   :  { %4483 = vmatpush3.bf16.msra.mxu0 %v4785_v30 }
 0x5bb   :  { %4484 = vmatprep.subr.bf16.mxu0 %v6052_v3  ;;  %2923 = vmatpush1.bf16.msra.mxu1 %v5801_v62 }
 0x5bc   :  { %2924 = vmatprep.subr.bf16.mxu1 %v5805_v31 }
 0x5be   :  { %4485 = vmatpush3.bf16.msra.mxu0 %v4786_v2 }
 0x5bf   :  { %4486 = vmatprep.subr.bf16.mxu0 %v6052_v3  ;;  %2925 = vmatpush1.bf16.msra.mxu1 %v5807_v32 }
 0x5c0   :  { %2926 = vmatprep.subr.bf16.mxu1 %v5811_v33 }
 0x5c2   :  { %4487 = vmatpush3.bf16.msra.mxu0 %v4787_v24 }
 0x5c3   :  { %4488 = vmatprep.subr.bf16.mxu0 %v6052_v3  ;;  %2927 = vmatpush1.bf16.msra.mxu1 %v5813_v34 }
 0x5c4   :  { %2928 = vmatprep.subr.bf16.mxu1 %v5817_v38 }
 0x5c6   :  { %4489 = vmatpush3.bf16.msra.mxu0 %v4788_v36 }
 0x5c7   :  { %4490 = vmatprep.subr.bf16.mxu0 %v6052_v3  ;;  %2929 = vmatpush1.bf16.msra.mxu1 %v5819_v40 }
 0x5c8   :  { %2930 = vmatprep.subr.bf16.mxu1 %v5822_v41 }
 0x5ca   :  { %4491 = vmatpush3.bf16.msra.mxu0 %v4789_v43 }
 0x5cb   :  { %4492 = vmatprep.subr.bf16.mxu0 %v6052_v3  ;;  %2931 = vmatpush1.bf16.msra.mxu1 %v5825_v44 }
 0x5cc   :  { %2932 = vmatprep.subr.bf16.mxu1 %v5828_v45 }
 0x5ce   :  { %4493 = vmatpush3.bf16.msra.mxu0 %v4790_v46 }
 0x5cf   :  { %4494 = vmatprep.subr.bf16.mxu0 %v6052_v3  ;;  %2933 = vmatpush1.bf16.msra.mxu1 %v5831_v48 }
 0x5d0   :  { %2934 = vmatprep.subr.bf16.mxu1 %v5834_v51 }
 0x5d2   :  { %4495 = vmatpush3.bf16.msra.mxu0 %v4791_v54 }
 0x5d3   :  { %4500 = vmatprep.subr.bf16.mxu0 %v6052_v3  ;;  %2935 = vmatpush1.bf16.msra.mxu1 %v5837_v37 }
 0x5d4   :  { %3137 = vmatprep.subr.bf16.mxu1 %v5701_v52  ;;  %v4796_v52 = vld [vmem:[#allocation11 + $0x68] ss:$12 sps:$4 sm:$0xff]  }
 0x5d5   :  { %4497 = vmatmul.mubr.bf16.vlgmr.msra.gmra.mrb[56].mxu0 %v2350_v26 }
 0x5d6   :  { %4516 = vmatprep.mubr.msk.bf16.mxu0 %vm5174_vm0, %v6052_v3  ;;  %4501 = vmatpush3.bf16.msra.mxu0 %v4792_v59 }
 0x5d7   :  { %4502 = vmatprep.subr.bf16.mxu0 %v6052_v3 }
 0x5da   :  { %4503 = vmatpush3.bf16.msra.mxu0 %v4793_v1 }
 0x5db   :  { %4504 = vmatprep.subr.bf16.mxu0 %v6052_v3 }
 0x5de   :  { %4505 = vmatpush3.bf16.msra.mxu0 %v4794_v60 }
 0x5df   :  { %4506 = vmatprep.subr.bf16.mxu0 %v6052_v3 }
 0x5e2   :  { %4507 = vmatpush3.bf16.msra.mxu0 %v4795_v27 }
 0x5e3   :  { %4508 = vmatprep.subr.bf16.mxu0 %v6052_v3 }
 0x5e6   :  { %4509 = vmatpush3.bf16.msra.mxu0 %v4796_v52 }
 0x5e7   :  { %4510 = vmatprep.subr.bf16.mxu0 %v6052_v3 }
 0x5ea   :  { %4511 = vmatpush3.bf16.msra.mxu0 %v4797_v57 }
 0x5eb   :  { %4512 = vmatprep.subr.bf16.mxu0 %v6052_v3 }
 0x5ee   :  { %4513 = vmatpush3.bf16.msra.mxu0 %v4798_v58 }
 0x5ef   :  { %4514 = vmatprep.subr.bf16.mxu0 %v6052_v3 }
 0x5f2   :  { %4515 = vmatpush3.bf16.msra.mxu0 %v4799_v47 }
 0x5f3   :  { %3381 = vmatprep.subr.bf16.mxu0 %v5792_v61 }
 0x688   :  { %v2493_v21 = vpop.f32.mrb[52].mxu0  ;;  %v2710_v17 = vpop.f32.mrb[16].mxu1 }
 0x689   :  { %v2494_v55 = vadd.f32 %v2493_v21, %v2372_v42  ;;  %v4556_v16 = vadd.f32 %v2710_v17, %v5567_v23  ;;  %v2495_v25 = vpop.f32.mrb[53].mxu0  ;;  %v2712_v26 = vpop.f32.mrb[17].mxu1 }
 0x68a   :  { %v2496_v30 = vadd.f32 %v2495_v25, %v2376_v53  ;;  %v2497_v2 = vpop.f32.mrb[54].mxu0  ;;  %v2714_v24 = vpop.f32.mrb[18].mxu1  ;;  %v4557_v60 = vadd.f32 %v2712_v26, %v5571_v50 }
 0x68b   :  { %2503 = vst [vmem:[#allocation14 + $0x30] sm:$0xff] %v2494_v55  ;;  %v4156_v61 = vmul.f32 -1.442695, %v4556_v16  ;;  %v2498_v36 = vadd.f32 %v2497_v2, %v2372_v42  ;;  %v4558_v43 = vadd.f32 %v2714_v24, %v5567_v23  ;;  %v2499_v46 = vpop.f32.mrb[55].mxu0  ;;  %v2716_v54 = vpop.f32.mrb[19].mxu1 }
 0x68c   :  { %2504 = vst [vmem:[#allocation14 + $0x38] sm:$0xff] %v2496_v30  ;;  %v2500_v59 = vadd.f32 %v2499_v46, %v2376_v53  ;;  %v4559_v27 = vadd.f32 %v2716_v54, %v5571_v50  ;;  %v4158_v52 = vmul.f32 -1.442695, %v4557_v60  ;;  %v6055_v46 = vld [vmem:[#allocation22_spill] sm:$0xff] }
 0x68d   :  { %2505 = vst [vmem:[#allocation14 + $0xa0] sm:$0xff] %v2498_v36  ;;  %v4157_v1 = vmul.f32 -1.442695, %v4558_v43  ;;  %4936 = vpow2.f32 %v4156_v61 }
 0x68e   :  { %2506 = vst [vmem:[#allocation14 + $0xa8] sm:$0xff] %v2500_v59  ;;  %v4159_v57 = vmul.f32 -1.442695, %v4559_v27 }
 0x68f   :  { %4938 = vpow2.f32 %v4157_v1  ;;  %v6056_v1 = vld [vmem:[#allocation23_spill] sm:$0xff] }
 0x690   :  { %4940 = vpow2.f32 %v4158_v52 }
 0x691   :  { %4942 = vpow2.f32 %v4159_v57 }
 0x697   :  { %v4937_v58 = vpop.eup %4936 }
 0x698   :  { %v2768_v35 = vadd.f32 1.0, %v4937_v58 }
 0x699   :  { %v4939_v47 = vpop.eup %4938 }
 0x69a   :  { %v2769_v42 = vadd.f32 1.0, %v4939_v47  ;;  %4944 = vrcp.f32 %v2768_v35  ;;  %v4941_v53 = vpop.eup %4940 }
 0x69b   :  { %v4943_v21 = vpop.eup %4942  ;;  %v2782_v17 = vadd.f32 1.0, %v4941_v53 }
 0x69c   :  { %4946 = vrcp.f32 %v2769_v42  ;;  %v2783_v16 = vadd.f32 1.0, %v4943_v21 }
 0x69d   :  { %4948 = vrcp.f32 %v2782_v17 }
 0x69e   :  { %4950 = vrcp.f32 %v2783_v16 }
 0x6a4   :  { %v4945_v30 = vpop.eup %4944 }
 0x6a6   :  { %v4947_v43 = vpop.eup %4946 }
 0x6a7   :  { %v4949_v27 = vpop.eup %4948 }
 0x6a8   :  { %v2753_v55 = vpop.f32.mrb[56].mxu0  ;;  %v4951_v52 = vpop.eup %4950  ;;  %v2803_v57 = vsub.f32 1.0, %v4949_v27  ;;  %v2807_v42 = vmul.f32 %v4949_v27, %v5862_v4 }
 0x6a9   :  { %v2795_v25 = vadd.f32 %v5854_v20, %v2753_v55  ;;  %v4498_v26 = vpop.f32.mrb[57].mxu0  ;;  %v2804_v47 = vsub.f32 1.0, %v4951_v52  ;;  %v2808_v17 = vmul.f32 %v4951_v52, %v5864_v22 }
 0x6aa   :  { %v2756_v2 = vpop.f32.mrb[58].mxu0 }
 0x6ab   :  { %v2797_v24 = vmul.f32 %v4945_v30, %v2795_v25  ;;  %v2796_v61 = vadd.f32 %v5854_v20, %v2756_v2  ;;  %v4499_v36 = vpop.f32.mrb[59].mxu0 }
 0x6ad   :  { %v2799_v54 = vadd.f32 %v2797_v24, %v6055_v46  ;;  %v2798_v59 = vmul.f32 %v4947_v43, %v2796_v61 }
 0x6af   :  { %4952 = vtanh.f32 %v2799_v54  ;;  %v2800_v60 = vadd.f32 %v2798_v59, %v6056_v1 }
 0x6b1   :  { %4954 = vtanh.f32 %v2800_v60 }
 0x6b9   :  { %v4953_v58 = vpop.eup %4952 }
 0x6ba   :  { %v2805_v35 = vmul.f32 %v4953_v58, %v2803_v57 }
 0x6bb   :  { %v4955_v53 = vpop.eup %4954 }
 0x6bc   :  { %v2806_v21 = vmul.f32 %v4955_v53, %v2804_v47  ;;  %v5920_v55 = vadd.f32 %v2807_v42, %v2805_v35 }
 0x6be   :  { %v5922_v16 = vadd.f32 %v2808_v17, %v2806_v21 }
 0x6c0   :  { %v2811_v25 = vpack.c.bf16 %v5922_v16, %v5920_v55 }
 0x6c2   :  { %2953 = vmatmul.mubr.bf16.vlgmr.msra.gmra.mrb[36].mxu1 %v2811_v25  ;;  %4517 = vmatmul.mubr.bf16.vlgmr.msra.gmra.mrb[60].mxu0 %v2811_v25 }
 0x6c3   :  { %3138 = vmatpush1.bf16.msra.mxu1 %v5726_v7  ;;  %3169 = vmatprep.mubr.bf16.mxu1 %v6051_v11  ;;  %v4802_v7 = vld [vmem:[#allocation11 + $0x4] ss:$12 sps:$4 sm:$0xff]  }
 0x6c4   :  { %3139 = vmatprep.subr.bf16.mxu1 %v5730_v9  ;;  %3382 = vmatpush1.bf16.msra.mxu0 %v5794_v12  ;;  %v4800_v9 = vld [vmem:[#allocation11] ss:$12 sps:$4 sm:$0xff]   ;;  %v4821_v12 = vld [vmem:[#allocation11 + $0xa8] ss:$12 sps:$4 sm:$0xff]  }
 0x6c5   :  { %3383 = vmatprep.subr.bf16.mxu0 %v5799_v56  ;;  %3413 = vmatprep.mubr.bf16.mxu0 %v6051_v11  ;;  %v2828_v56 = vld [vmem:[%s6033_s9] sm:$0x3] }
 0x6c7   :  { %3140 = vmatpush1.bf16.msra.mxu1 %v5733_v14  ;;  %v4805_v14 = vld [vmem:[#allocation11 + $0x1c] ss:$12 sps:$4 sm:$0xff]  }
 0x6c8   :  { %3141 = vmatprep.subr.bf16.mxu1 %v5737_v18  ;;  %3384 = vmatpush1.bf16.msra.mxu0 %v5801_v62  ;;  %v4803_v18 = vld [vmem:[#allocation11 + $0x18] ss:$12 sps:$4 sm:$0xff]   ;;  %v2833_v62 = vrot.slane %v2828_v56, %v5560_v13 }
 0x6c9   :  { %3385 = vmatprep.subr.bf16.mxu0 %v5805_v31  ;;  %v2837_v31 = vrot.slane %v2828_v56, %v5563_v19 }
 0x6cb   :  { %3142 = vmatpush1.bf16.msra.mxu1 %v5741_v15  ;;  %v4808_v15 = vld [vmem:[#allocation11 + $0x34] ss:$12 sps:$4 sm:$0xff]  }
 0x6cc   :  { %3143 = vmatprep.subr.bf16.mxu1 %v5744_v29  ;;  %3386 = vmatpush1.bf16.msra.mxu0 %v5807_v32  ;;  %v4806_v29 = vld [vmem:[#allocation11 + $0x30] ss:$12 sps:$4 sm:$0xff]  }
 0x6cd   :  { %3387 = vmatprep.subr.bf16.mxu0 %v5811_v33 }
 0x6cf   :  { %3144 = vmatpush1.bf16.msra.mxu1 %v5747_v63  ;;  %v4811_v63 = vld [vmem:[#allocation11 + $0x4c] ss:$12 sps:$4 sm:$0xff]  }
 0x6d0   :  { %3145 = vmatprep.subr.bf16.mxu1 %v5750_v39  ;;  %3388 = vmatpush1.bf16.msra.mxu0 %v5813_v34  ;;  %v4809_v39 = vld [vmem:[#allocation11 + $0x48] ss:$12 sps:$4 sm:$0xff]  }
 0x6d1   :  { %3389 = vmatprep.subr.bf16.mxu0 %v5817_v38 }
 0x6d3   :  { %3146 = vmatpush1.bf16.msra.mxu1 %v5753_v49  ;;  %v4814_v49 = vld [vmem:[#allocation11 + $0x64] ss:$12 sps:$4 sm:$0xff]  }
 0x6d4   :  { %3147 = vmatprep.subr.bf16.mxu1 %v5756_v28  ;;  %3390 = vmatpush1.bf16.msra.mxu0 %v5819_v40  ;;  %v4812_v28 = vld [vmem:[#allocation11 + $0x60] ss:$12 sps:$4 sm:$0xff]  }
 0x6d5   :  { %3391 = vmatprep.subr.bf16.mxu0 %v5822_v41 }
 0x6d7   :  { %3148 = vmatpush1.bf16.msra.mxu1 %v5759_v8  ;;  %v4817_v8 = vld [vmem:[#allocation11 + $0x7c] ss:$12 sps:$4 sm:$0xff]  }
 0x6d8   :  { %3149 = vmatprep.subr.bf16.mxu1 %v5762_v10  ;;  %3392 = vmatpush1.bf16.msra.mxu0 %v5825_v44  ;;  %v4815_v10 = vld [vmem:[#allocation11 + $0x78] ss:$12 sps:$4 sm:$0xff]  }
 0x6d9   :  { %3393 = vmatprep.subr.bf16.mxu0 %v5828_v45 }
 0x6db   :  { %3150 = vmatpush1.bf16.msra.mxu1 %v5765_v5  ;;  %v4820_v5 = vld [vmem:[#allocation11 + $0x94] ss:$12 sps:$4 sm:$0xff]  }
 0x6dc   :  { %3151 = vmatprep.subr.bf16.mxu1 %v5768_v6  ;;  %3394 = vmatpush1.bf16.msra.mxu0 %v5831_v48  ;;  %v4818_v6 = vld [vmem:[#allocation11 + $0x90] ss:$12 sps:$4 sm:$0xff]  }
 0x6dd   :  { %3395 = vmatprep.subr.bf16.mxu0 %v5834_v51 }
 0x6df   :  { %3152 = vmatpush1.bf16.msra.mxu1 %v5771_v0  ;;  %v4823_v0 = vld [vmem:[#allocation11 + $0xac] ss:$12 sps:$4 sm:$0xff]  }
 0x6e0   :  { %3396 = vmatpush1.bf16.msra.mxu0 %v5837_v37  ;;  %3598 = vmatprep.subr.bf16.mxu1 %v4802_v7 }
 0x6e1   :  { %4520 = vmatprep.subr.bf16.mxu0 %v6052_v3 }
 0x6e2   :  { %3170 = vmatmul.mubr.bf16.vlgmr.msra.gmra.mrb[20].mxu1 %v2811_v25 }
 0x6e3   :  { %3630 = vmatprep.mubr.bf16.mxu1 %v6051_v11  ;;  %3599 = vmatpush1.bf16.msra.mxu1 %v4800_v9  ;;  %v6057_v9 = vld [vmem:[#allocation24_spill] sm:$0xff] }
 0x6e4   :  { %3600 = vmatprep.subr.bf16.mxu1 %v4805_v14 }
 0x6e7   :  { %3601 = vmatpush1.bf16.msra.mxu1 %v4803_v18 }
 0x6e8   :  { %3602 = vmatprep.subr.bf16.mxu1 %v4808_v15  ;;  %v6058_v15 = vld [vmem:[#allocation25_spill] sm:$0xff] }
 0x6eb   :  { %3603 = vmatpush1.bf16.msra.mxu1 %v4806_v29 }
 0x6ec   :  { %3604 = vmatprep.subr.bf16.mxu1 %v4811_v63 }
 0x6ef   :  { %3605 = vmatpush1.bf16.msra.mxu1 %v4809_v39 }
 0x6f0   :  { %3606 = vmatprep.subr.bf16.mxu1 %v4814_v49 }
 0x6f3   :  { %3607 = vmatpush1.bf16.msra.mxu1 %v4812_v28 }
 0x6f4   :  { %3608 = vmatprep.subr.bf16.mxu1 %v4817_v8 }
 0x6f7   :  { %3609 = vmatpush1.bf16.msra.mxu1 %v4815_v10 }
 0x6f8   :  { %3610 = vmatprep.subr.bf16.mxu1 %v4820_v5 }
 0x6fb   :  { %3611 = vmatpush1.bf16.msra.mxu1 %v4818_v6 }
 0x6fc   :  { %3612 = vmatprep.subr.bf16.mxu1 %v4823_v0 }
 0x6ff   :  { %3613 = vmatpush1.bf16.msra.mxu1 %v4821_v12 }
 0x795   :  { %v2954_v32 = vpop.f32.mrb[36].mxu1  ;;  %v3214_v33 = vpop.f32.mrb[60].mxu0 }
 0x796   :  { %v2955_v34 = vadd.f32 %v2954_v32, %v2833_v62  ;;  %v2956_v38 = vpop.f32.mrb[37].mxu1  ;;  %v4518_v40 = vpop.f32.mrb[61].mxu0  ;;  %v3256_v42 = vadd.f32 %v5854_v20, %v3214_v33  ;;  %v4825_v32 = vld [vmem:[#allocation11 + $0x20] ss:$12 sps:$4 sm:$0xff]   ;;  %v4828_v33 = vld [vmem:[#allocation11 + $0x68] ss:$12 sps:$4 sm:$0xff]  }
 0x797   :  { %v2957_v41 = vadd.f32 %v2956_v38, %v2837_v31  ;;  %v2958_v44 = vpop.f32.mrb[38].mxu1  ;;  %v3217_v45 = vpop.f32.mrb[62].mxu0  ;;  %v4830_v38 = vld [vmem:[#allocation11 + $0x98] ss:$12 sps:$4 sm:$0xff]   ;;  %v4832_v40 = vld [vmem:[#allocation12] ss:$8 sps:$4 sm:$0xff]  }
 0x798   :  { %2964 = vst [vmem:[#allocation14 + $0x40] sm:$0xff] %v2955_v34  ;;  %v2959_v48 = vadd.f32 %v2958_v44, %v2833_v62  ;;  %v2960_v51 = vpop.f32.mrb[39].mxu1  ;;  %v4519_v37 = vpop.f32.mrb[63].mxu0  ;;  %v3257_v17 = vadd.f32 %v5854_v20, %v3217_v45  ;;  %v4824_v62 = vld [vmem:[#allocation11 + $0x8] ss:$12 sps:$4 sm:$0xff]  }
 0x799   :  { %2965 = vst [vmem:[#allocation14 + $0x48] sm:$0xff] %v2957_v41  ;;  %v2961_v4 = vadd.f32 %v2960_v51, %v2837_v31  ;;  %v4829_v34 = vld [vmem:[#allocation11 + $0x80] ss:$12 sps:$4 sm:$0xff]   ;;  %v4837_v44 = vld [vmem:[#allocation12 + $0x14] ss:$8 sps:$4 sm:$0xff]  }
 0x79a   :  { %2966 = vst [vmem:[#allocation14 + $0xb0] sm:$0xff] %v2959_v48  ;;  %v4834_v41 = vld [vmem:[#allocation12 + $0x4] ss:$8 sps:$4 sm:$0xff]   ;;  %v4835_v45 = vld [vmem:[#allocation12 + $0x10] ss:$8 sps:$4 sm:$0xff]  }
 0x79b   :  { %2967 = vst [vmem:[#allocation14 + $0xb8] sm:$0xff] %v2961_v4  ;;  %3842 = vmatprep.subr.bf16.mxu1 %v4834_v41  ;;  %v4840_v48 = vld [vmem:[#allocation12 + $0x24] ss:$8 sps:$4 sm:$0xff]   ;;  %v4838_v51 = vld [vmem:[#allocation12 + $0x20] ss:$8 sps:$4 sm:$0xff]  }
 0x79c   :  { %v4843_v37 = vld [vmem:[#allocation12 + $0x34] ss:$8 sps:$4 sm:$0xff]   ;;  %v4841_v4 = vld [vmem:[#allocation12 + $0x30] ss:$8 sps:$4 sm:$0xff]  }
 0x7b5   :  { %v3171_v22 = vpop.f32.mrb[20].mxu1 }
 0x7b6   :  { %v4560_v26 = vadd.f32 %v3171_v22, %v5567_v23  ;;  %v3173_v30 = vpop.f32.mrb[21].mxu1  ;;  %v4846_v22 = vld [vmem:[#allocation12 + $0x44] ss:$8 sps:$4 sm:$0xff]  }
 0x7b7   :  { %v3175_v2 = vpop.f32.mrb[22].mxu1  ;;  %v4561_v43 = vadd.f32 %v3173_v30, %v5571_v50  ;;  %v4847_v30 = vld [vmem:[#allocation12 + $0x50] ss:$8 sps:$4 sm:$0xff]  }
 0x7b8   :  { %v4201_v24 = vmul.f32 -1.442695, %v4560_v26  ;;  %v4562_v61 = vadd.f32 %v3175_v2, %v5567_v23  ;;  %v3177_v36 = vpop.f32.mrb[23].mxu1  ;;  %v4849_v26 = vld [vmem:[#allocation12 + $0x54] ss:$8 sps:$4 sm:$0xff]  }
 0x7b9   :  { %v4563_v54 = vadd.f32 %v3177_v36, %v5571_v50  ;;  %v4203_v59 = vmul.f32 -1.442695, %v4561_v43  ;;  %v4852_v2 = vld [vmem:[#allocation12 + $0x64] ss:$8 sps:$4 sm:$0xff]   ;;  %v4853_v36 = vld [vmem:[#allocation12 + $0x70] ss:$8 sps:$4 sm:$0xff]  }
 0x7ba   :  { %4956 = vpow2.f32 %v4201_v24  ;;  %v4202_v46 = vmul.f32 -1.442695, %v4562_v61  ;;  %v4850_v24 = vld [vmem:[#allocation12 + $0x60] ss:$8 sps:$4 sm:$0xff]   ;;  %v4855_v61 = vld [vmem:[#allocation12 + $0x74] ss:$8 sps:$4 sm:$0xff]  }
 0x7bb   :  { %v4204_v1 = vmul.f32 -1.442695, %v4563_v54  ;;  %v3289_v43 = vld [vmem:[%s6033_s9] sm:$0x3] }
 0x7bc   :  { %4958 = vpow2.f32 %v4202_v46  ;;  %v3294_v46 = vrot.slane %v3289_v43, %v5560_v13  ;;  %v3298_v54 = vrot.slane %v3289_v43, %v5563_v19 }
 0x7bd   :  { %4960 = vpow2.f32 %v4203_v59 }
 0x7be   :  { %4962 = vpow2.f32 %v4204_v1 }
 0x7c4   :  { %v4957_v60 = vpop.eup %4956 }
 0x7c5   :  { %v3229_v27 = vadd.f32 1.0, %v4957_v60 }
 0x7c6   :  { %v4959_v52 = vpop.eup %4958 }
 0x7c7   :  { %4964 = vrcp.f32 %v3229_v27  ;;  %v3230_v57 = vadd.f32 1.0, %v4959_v52  ;;  %v4961_v58 = vpop.eup %4960 }
 0x7c8   :  { %v4963_v47 = vpop.eup %4962  ;;  %v3243_v35 = vadd.f32 1.0, %v4961_v58 }
 0x7c9   :  { %4966 = vrcp.f32 %v3230_v57  ;;  %v3244_v53 = vadd.f32 1.0, %v4963_v47 }
 0x7ca   :  { %4968 = vrcp.f32 %v3243_v35 }
 0x7cb   :  { %4970 = vrcp.f32 %v3244_v53 }
 0x7d1   :  { %v4965_v21 = vpop.eup %4964 }
 0x7d2   :  { %v3258_v25 = vmul.f32 %v4965_v21, %v3256_v42 }
 0x7d3   :  { %v4967_v7 = vpop.eup %4966 }
 0x7d4   :  { %v3260_v14 = vadd.f32 %v3258_v25, %v6057_v9  ;;  %v3259_v18 = vmul.f32 %v4967_v7, %v3257_v17  ;;  %v4969_v63 = vpop.eup %4968 }
 0x7d5   :  { %v4971_v39 = vpop.eup %4970  ;;  %v3264_v49 = vsub.f32 1.0, %v4969_v63  ;;  %v3268_v5 = vmul.f32 %v4969_v63, %v5920_v55  ;;  %v4826_v55 = vld [vmem:[#allocation11 + $0x38] ss:$12 sps:$4 sm:$0xff]  }
 0x7d6   :  { %4972 = vtanh.f32 %v3260_v14  ;;  %v3261_v29 = vadd.f32 %v3259_v18, %v6058_v15  ;;  %v3265_v8 = vsub.f32 1.0, %v4971_v39  ;;  %v3269_v0 = vmul.f32 %v4971_v39, %v5922_v16  ;;  %v4827_v16 = vld [vmem:[#allocation11 + $0x50] ss:$12 sps:$4 sm:$0xff]  }
 0x7d8   :  { %4974 = vtanh.f32 %v3261_v29 }
 0x7e0   :  { %v4973_v28 = vpop.eup %4972 }
 0x7e1   :  { %v3266_v10 = vmul.f32 %v4973_v28, %v3264_v49 }
 0x7e2   :  { %v4975_v20 = vpop.eup %4974 }
 0x7e3   :  { %v3267_v6 = vmul.f32 %v4975_v20, %v3265_v8  ;;  %v5975_v12 = vadd.f32 %v3268_v5, %v3266_v10  ;;  %v4250_v10 = vld [vmem:[%s6031_s7] ss:$0 sm:$0xff] }
 0x7e5   :  { %v5977_v56 = vadd.f32 %v3269_v0, %v3267_v6 }
 0x7e7   :  { %v3272_v31 = vpack.c.bf16 %v5977_v56, %v5975_v12 }
 0x7e9   :  { %3414 = vmatmul.mubr.bf16.vlgmr.msra.gmra.mrb[64].mxu0 %v3272_v31  ;;  %3631 = vmatmul.mubr.bf16.vlgmr.msra.gmra.mrb[24].mxu1 %v3272_v31 }
 0x7ea   :  { %4521 = vmatpush3.bf16.msra.mxu0 %v4824_v62  ;;  %4536 = vmatprep.mubr.msk.bf16.mxu0 %vm5174_vm0, %v6052_v3 }
 0x7eb   :  { %4522 = vmatprep.subr.bf16.mxu0 %v6052_v3  ;;  %3874 = vmatprep.mubr.bf16.mxu1 %v6051_v11  ;;  %v4831_v11 = vld [vmem:[#allocation11 + $0xb0] ss:$12 sps:$4 sm:$0xff]  }
 0x7ec   :  { %3843 = vmatpush1.bf16.msra.mxu1 %v4832_v40  ;;  %v6060_v40 = vld [vmem:[#allocation27_spill] sm:$0xff] }
 0x7ed   :  { %3844 = vmatprep.subr.bf16.mxu1 %v4837_v44 }
 0x7ee   :  { %4523 = vmatpush3.bf16.msra.mxu0 %v4825_v32 }
 0x7ef   :  { %4524 = vmatprep.subr.bf16.mxu0 %v6052_v3 }
 0x7f0   :  { %3845 = vmatpush1.bf16.msra.mxu1 %v4835_v45 }
 0x7f1   :  { %3846 = vmatprep.subr.bf16.mxu1 %v4840_v48 }
 0x7f2   :  { %4525 = vmatpush3.bf16.msra.mxu0 %v4826_v55 }
 0x7f3   :  { %4526 = vmatprep.subr.bf16.mxu0 %v6052_v3 }
 0x7f4   :  { %3847 = vmatpush1.bf16.msra.mxu1 %v4838_v51 }
 0x7f5   :  { %3848 = vmatprep.subr.bf16.mxu1 %v4843_v37 }
 0x7f6   :  { %4527 = vmatpush3.bf16.msra.mxu0 %v4827_v16 }
 0x7f7   :  { %4528 = vmatprep.subr.bf16.mxu0 %v6052_v3 }
 0x7f8   :  { %3849 = vmatpush1.bf16.msra.mxu1 %v4841_v4 }
 0x7f9   :  { %3850 = vmatprep.subr.bf16.mxu1 %v4846_v22 }
 0x7fa   :  { %4529 = vmatpush3.bf16.msra.mxu0 %v4828_v33 }
 0x7fb   :  { %4530 = vmatprep.subr.bf16.mxu0 %v6052_v3 }
 0x7fe   :  { %4531 = vmatpush3.bf16.msra.mxu0 %v4829_v34  ;;  %v6059_v34 = vld [vmem:[#allocation26_spill] sm:$0xff] }
 0x7ff   :  { %4532 = vmatprep.subr.bf16.mxu0 %v6052_v3 }
 0x802   :  { %4533 = vmatpush3.bf16.msra.mxu0 %v4830_v38 }
 0x803   :  { %4534 = vmatprep.subr.bf16.mxu0 %v6052_v3  ;;  %v4844_v3 = vld [vmem:[#allocation12 + $0x40] ss:$8 sps:$4 sm:$0xff]  }
 0x804   :  { %3851 = vmatpush1.bf16.msra.mxu1 %v4844_v3 }
 0x805   :  { %3852 = vmatprep.subr.bf16.mxu1 %v4849_v26 }
 0x806   :  { %4535 = vmatpush3.bf16.msra.mxu0 %v4831_v11 }
 0x808   :  { %3853 = vmatpush1.bf16.msra.mxu1 %v4847_v30 }
 0x809   :  { %4537 = vmatmul.mubr.bf16.vlgmr.msra.gmra.mrb[68].mxu0 %v3272_v31  ;;  %3854 = vmatprep.subr.bf16.mxu1 %v4852_v2 }
 0x80c   :  { %3855 = vmatpush1.bf16.msra.mxu1 %v4850_v24 }
 0x80d   :  { %3856 = vmatprep.subr.bf16.mxu1 %v4855_v61 }
 0x810   :  { %3857 = vmatpush1.bf16.msra.mxu1 %v4853_v36  ;;  %v3750_v36 = vld [vmem:[%s6033_s9] sm:$0x3]  ;;  %s5129_s9 = scalar_lea.vmem %s3896_s6, 3584 }
 0x811   :  { %v3755_v43 = vrot.slane %v3750_v36, %v5560_v13  ;;  %p5130_p6 = scmp.ne.s32.totalorder %s3896_s6, %s5129_s9  ;;  %p5135_p8 = scmp.lt.s32.totalorder %s5129_s9, %s5129_s9 }
 0x813   :  { %p5136_p9 = por %p5135_p8, %p5134_p7 }
 0x815   :  { %p5137_p10 = pnand %p5136_p9, %p5130_p6 }
 0x8bc   :  { %v3415_v59 = vpop.f32.mrb[64].mxu0  ;;  %v3632_v1 = vpop.f32.mrb[24].mxu1 }
 0x8bd   :  { %v3416_v60 = vadd.f32 %v3415_v59, %v3294_v46  ;;  %v4564_v27 = vadd.f32 %v3632_v1, %v5567_v23  ;;  %v3417_v52 = vpop.f32.mrb[65].mxu0  ;;  %v3634_v57 = vpop.f32.mrb[25].mxu1 }
 0x8be   :  { %v3418_v58 = vadd.f32 %v3417_v52, %v3298_v54  ;;  %v3419_v47 = vpop.f32.mrb[66].mxu0  ;;  %v3636_v35 = vpop.f32.mrb[26].mxu1  ;;  %v4565_v14 = vadd.f32 %v3634_v57, %v5571_v50 }
 0x8bf   :  { %3425 = vst [vmem:[#allocation14 + $0x50] sm:$0xff] %v3416_v60  ;;  %v4246_v42 = vmul.f32 -1.442695, %v4564_v27  ;;  %v3420_v53 = vadd.f32 %v3419_v47, %v3294_v46  ;;  %v4566_v21 = vadd.f32 %v3636_v35, %v5567_v23  ;;  %v3421_v17 = vpop.f32.mrb[67].mxu0  ;;  %v3638_v25 = vpop.f32.mrb[27].mxu1  ;;  %v3759_v46 = vrot.slane %v3750_v36, %v5563_v19 }
 0x8c0   :  { %3426 = vst [vmem:[#allocation14 + $0x58] sm:$0xff] %v3418_v58  ;;  %v3422_v7 = vadd.f32 %v3421_v17, %v3298_v54  ;;  %v4567_v18 = vadd.f32 %v3638_v25, %v5571_v50  ;;  %v4248_v15 = vmul.f32 -1.442695, %v4565_v14 }
 0x8c1   :  { %3427 = vst [vmem:[#allocation14 + $0xc0] sm:$0xff] %v3420_v53  ;;  %v4247_v9 = vmul.f32 -1.442695, %v4566_v21  ;;  %4976 = vpow2.f32 %v4246_v42 }
 0x8c2   :  { %3428 = vst [vmem:[#allocation14 + $0xc8] sm:$0xff] %v3422_v7  ;;  %v4249_v29 = vmul.f32 -1.442695, %v4567_v18 }
 0x8c3   :  { %4978 = vpow2.f32 %v4247_v9 }
 0x8c4   :  { %4980 = vpow2.f32 %v4248_v15 }
 0x8c5   :  { %4982 = vpow2.f32 %v4249_v29 }
 0x8cb   :  { %v4977_v63 = vpop.eup %4976 }
 0x8cc   :  { %v3690_v49 = vadd.f32 1.0, %v4977_v63 }
 0x8cd   :  { %v4979_v39 = vpop.eup %4978 }
 0x8ce   :  { %v3691_v23 = vadd.f32 1.0, %v4979_v39  ;;  %4984 = vrcp.f32 %v3690_v49  ;;  %v4981_v28 = vpop.eup %4980 }
 0x8cf   :  { %v4983_v8 = vpop.eup %4982  ;;  %v3704_v5 = vadd.f32 1.0, %v4981_v28 }
 0x8d0   :  { %4986 = vrcp.f32 %v3691_v23  ;;  %v3705_v6 = vadd.f32 1.0, %v4983_v8 }
 0x8d1   :  { %4988 = vrcp.f32 %v3704_v5 }
 0x8d2   :  { %4990 = vrcp.f32 %v3705_v6 }
 0x8d8   :  { %v4985_v62 = vpop.eup %4984 }
 0x8da   :  { %v4987_v33 = vpop.eup %4986 }
 0x8db   :  { %v4989_v44 = vpop.eup %4988 }
 0x8dc   :  { %v3675_v20 = vpop.f32.mrb[68].mxu0  ;;  %v4991_v45 = vpop.eup %4990  ;;  %v3725_v48 = vsub.f32 1.0, %v4989_v44  ;;  %v3729_v22 = vmul.f32 %v4989_v44, %v5975_v12 }
 0x8dd   :  { %v3717_v50 = vadd.f32 %v4250_v10, %v3675_v20  ;;  %v4538_v0 = vpop.f32.mrb[69].mxu0  ;;  %v3726_v37 = vsub.f32 1.0, %v4991_v45  ;;  %v3730_v30 = vmul.f32 %v4991_v45, %v5977_v56 }
 0x8de   :  { %v3678_v31 = vpop.f32.mrb[70].mxu0 }
 0x8df   :  { %v3719_v32 = vmul.f32 %v4985_v62, %v3717_v50  ;;  %v3718_v55 = vadd.f32 %v4250_v10, %v3678_v31  ;;  %v4539_v16 = vpop.f32.mrb[71].mxu0 }
 0x8e1   :  { %v3721_v38 = vadd.f32 %v3719_v32, %v6059_v34  ;;  %v3720_v11 = vmul.f32 %v4987_v33, %v3718_v55 }
 0x8e3   :  { %4992 = vtanh.f32 %v3721_v38  ;;  %v3722_v41 = vadd.f32 %v3720_v11, %v6060_v40 }
 0x8e5   :  { %4994 = vtanh.f32 %v3722_v41 }
 0x8ed   :  { %v4993_v51 = vpop.eup %4992 }
 0x8ee   :  { %v3727_v4 = vmul.f32 %v4993_v51, %v3725_v48 }
 0x8ef   :  { %v4995_v3 = vpop.eup %4994 }
 0x8f0   :  { %v3728_v26 = vmul.f32 %v4995_v3, %v3726_v37  ;;  %v3731_v2 = vadd.f32 %v3729_v22, %v3727_v4 }
 0x8f2   :  { %v3732_v24 = vadd.f32 %v3730_v30, %v3728_v26 }
 0x8f4   :  { %v3733_v61 = vpack.c.bf16 %v3732_v24, %v3731_v2 }
 0x8f6   :  { %3875 = vmatmul.mubr.bf16.vlgmr.msra.gmra.mrb[40].mxu1 %v3733_v61 }
 0x9c9   :  { %v3876_v54 = vpop.f32.mrb[40].mxu1 }
 0x9ca   :  { %v3877_v12 = vadd.f32 %v3876_v54, %v3755_v43  ;;  %v3878_v59 = vpop.f32.mrb[41].mxu1 }
 0x9cb   :  { %v3879_v1 = vadd.f32 %v3878_v59, %v3759_v46  ;;  %v3880_v60 = vpop.f32.mrb[42].mxu1 }
 0x9cc   :  { %3886 = vst [vmem:[#allocation14 + $0x60] sm:$0xff] %v3877_v12  ;;  %v3881_v56 = vadd.f32 %v3880_v60, %v3755_v43  ;;  %v3882_v27 = vpop.f32.mrb[43].mxu1 }
 0x9cd   :  { %3887 = vst [vmem:[#allocation14 + $0x68] sm:$0xff] %v3879_v1  ;;  %v3883_v52 = vadd.f32 %v3882_v27, %v3759_v46 }
 0x9ce   :  { %3888 = vst [vmem:[#allocation14 + $0xd0] sm:$0xff] %v3881_v56 }
 0x9cf   :  { %3889 = vst [vmem:[#allocation14 + $0xd8] sm:$0xff] %v3883_v52 }
 0x9d0   :  { %5140 = shalt.err (!%p5137_p10)
}
 0x9d1   :  { %s5141_s29 = scalar_lea.hbm %s6034_s10, 3584 }
 0x9d2   :  { %p5142_p11 = scmp.ne.s32.totalorder %s6034_s10, %s5141_s29  ;;  %p5145_p12 = scmp.lt.u32.totalorder %s5141_s29, %s6034_s10 }
 0x9d4   :  { %p5147_p13 = pnand %p5145_p12, %p5142_p11 }
 0x9d6   :  { %5150 = shalt.err (!%p5147_p13)
}
 0x9d7   :  { %s5177_s5 = smov 1792   ;;  %s5178_s12 = smov 112  }
 0x9d8   :  { %3901 = dma.vmem_to_hbm [thread:$0]  %s3896_s6, 3584, %s6034_s10, [#allocation5], %s5177_s5, %s5177_s5, %s5178_s12  }
 0x9d9   :  { %5159 = dma.done.wait [#allocation5], 3584  }
 0x9da   :  { %5160 = vsyncadd [#allocation5], 4294963712 }
 0x9db   :  { %3905 = vsyncpa [#allocation4], 1 }
 0x9dc   :  { %3906 = vsyncpa [#allocation7], 1 }
 0x9dd   :  { %3907 = vsyncpa [#allocation10], 1 }
 0x9de   :  { %3908 = vsyncpa [#allocation13], 1 }
 0x9df   :  { %3909 = vsyncpa [#allocation5], 1 }

</bundles_post_ra>
